<compile_context>
chip_gen: v7x
topology: tpu7x:2x2x1
jax: 0.10.0
libtpu: 0.0.40
codegen_flags: <defaults>
</compile_context>

<pallas_src>
import functools
import math

import jax
import jax.numpy as jnp
from jax.experimental import pallas as pl
from jax.experimental.pallas import tpu as pltpu


def _round_up(x, m):
    return (x + m - 1) // m * m


def _pick_tile(total, target):
    """Largest multiple of 8 that divides `total` (a multiple of 8) and is <= target."""
    t = max(8, min(target, total) // 8 * 8)
    while total % t:
        t -= 8
    return t


_GELU_C = math.sqrt(2.0 / math.pi)


def _gelu_tanh(x):
    # TODO(synk): torch nn.GELU default is exact-erf; tanh approximation used here
    # (max abs deviation ~1e-3) to stay on guaranteed Mosaic-lowerable elementwise ops.
    return 0.5 * x * (1.0 + jnp.tanh(_GELU_C * (x + 0.044715 * x * x * x)))


# ----------------------------------------------------------------------------
# Kernel 1: linear  (y = act(x @ w + b)), bf16 MXU operands, f32 accumulate
# ----------------------------------------------------------------------------
def _linear_kernel(x_ref, w_ref, b_ref, o_ref, *, activation):
    y = jnp.dot(x_ref[...].astype(jnp.bfloat16), w_ref[...].astype(jnp.bfloat16),
                preferred_element_type=jnp.float32)
    y = y + b_ref[...].astype(jnp.float32)
    if activation == "gelu":
        y = _gelu_tanh(y)
    o_ref[...] = y.astype(o_ref.dtype)


def _linear_kernel_ktiled(x_ref, w_ref, b_ref, o_ref, acc_ref, *, activation):
    @pl.when(pl.program_id(2) == 0)
    def _():
        acc_ref[...] = jnp.zeros_like(acc_ref)

    acc_ref[...] += jnp.dot(x_ref[...].astype(jnp.bfloat16),
                            w_ref[...].astype(jnp.bfloat16),
                            preferred_element_type=jnp.float32)

    @pl.when(pl.program_id(2) == pl.num_programs(2) - 1)
    def _():
        y = acc_ref[...] + b_ref[...].astype(jnp.float32)
        if activation == "gelu":
            y = _gelu_tanh(y)
        o_ref[...] = y.astype(o_ref.dtype)


_K_SINGLE_MAX = 2048   # contract in a single MXU pass when K fits VMEM comfortably


def linear(x, w, b, *, activation=None):
    """activation(x @ w + b); x: (..., K), w: (K, N) (bf16 or f32), b: (N,)."""
    orig_shape = x.shape
    K = orig_shape[-1]
    N = w.shape[1]
    x2 = x.reshape(-1, K)
    M = x2.shape[0]
    b2 = b.reshape(1, N).astype(jnp.float32)

    Mp = _round_up(M, 8)
    if Mp != M:                               # row remainder only (rare)
        x2 = jnp.zeros((Mp, K), x.dtype).at[:M].set(x2)

    # ---- N (lane) tiling: 128-multiples when possible, full-extent otherwise ----
    if N % 128 == 0:
        tn = min(512, N)
        while N % tn:
            tn -= 128
        Np, wp, bp = N, w, b2
    elif N <= 1024:
        tn, Np, wp, bp = N, N, w, b2          # full-extent block (legal for any N)
    else:
        Np = _round_up(N, 128)
        tn = 128
        wp = jnp.zeros((K, Np), w.dtype).at[:, :N].set(w)
        bp = jnp.zeros((1, Np), jnp.float32).at[:, :N].set(b2)

    tm = _pick_tile(Mp, 256)

    cost = pl.CostEstimate(
        flops=int(2 * M * K * N),
        transcendentals=int(M * N if activation == "gelu" else 0),
        bytes_accessed=int(M * K * x2.dtype.itemsize + K * N * wp.dtype.itemsize
                           + M * N * x.dtype.itemsize))

    if K <= _K_SINGLE_MAX:
        # keep >=2 grid steps where possible so v7x's two TensorCores both work
        if Mp // tm == 1 and Np // tn == 1 and Mp >= 16:
            tm = _pick_tile(Mp, Mp // 2)
        grid = (Mp // tm, Np // tn)
        vmem_limit = int(min(48 << 20,
                             2 * (tm * K * x2.dtype.itemsize
                                  + K * tn * wp.dtype.itemsize
                                  + tn * 4 + tm * tn * x.dtype.itemsize) + (8 << 20)))
        out = pl.pallas_call(
            functools.partial(_linear_kernel, activation=activation),
            out_shape=jax.ShapeDtypeStruct((Mp, Np), x.dtype),
            grid=grid,
            in_specs=[
                pl.BlockSpec((tm, K), lambda i, j: (i, 0)),
                pl.BlockSpec((K, tn), lambda i, j: (0, j)),
                pl.BlockSpec((1, tn), lambda i, j: (0, j)),
            ],
            out_specs=pl.BlockSpec((tm, tn), lambda i, j: (i, j)),
            compiler_params=pltpu.CompilerParams(
                dimension_semantics=("parallel", "parallel"),
                vmem_limit_bytes=vmem_limit),
            cost_estimate=cost,
        )(x2, wp, bp)
    else:
        # K-tiled fallback with f32 accumulator scratch (very large contractions only).
        tk = 512
        Kp = _round_up(K, tk)
        xk = jnp.zeros((Mp, Kp), x.dtype).at[:, :K].set(x2) if Kp != K else x2
        wk = jnp.zeros((Kp, Np), wp.dtype).at[:K].set(wp) if Kp != K else wp
        vmem_limit = int(min(48 << 20,
                             2 * (tm * tk * xk.dtype.itemsize
                                  + tk * tn * wk.dtype.itemsize
                                  + tn * 4 + tm * tn * x.dtype.itemsize)
                             + tm * tn * 4 + (8 << 20)))
        out = pl.pallas_call(
            functools.partial(_linear_kernel_ktiled, activation=activation),
            out_shape=jax.ShapeDtypeStruct((Mp, Np), x.dtype),
            grid=(Mp // tm, Np // tn, Kp // tk),
            in_specs=[
                pl.BlockSpec((tm, tk), lambda i, j, k: (i, k)),
                pl.BlockSpec((tk, tn), lambda i, j, k: (k, j)),
                pl.BlockSpec((1, tn), lambda i, j, k: (0, j)),
            ],
            out_specs=pl.BlockSpec((tm, tn), lambda i, j, k: (i, j)),
            scratch_shapes=[pltpu.VMEM((tm, tn), jnp.float32)],
            compiler_params=pltpu.CompilerParams(
                dimension_semantics=("parallel", "parallel", "arbitrary"),
                vmem_limit_bytes=vmem_limit),
            cost_estimate=cost,
        )(xk, wk, bp)

    if Mp != M or Np != N:
        out = out[:M, :N]
    return out.reshape(orig_shape[:-1] + (N,))


# ----------------------------------------------------------------------------
# Kernel 2: fused residual-add + LayerNorm (two-pass mean/variance)
# ----------------------------------------------------------------------------
def _add_ln_kernel(x_ref, r_ref, g_ref, b_ref, o_ref, *, eps, inv_n):
    x = x_ref[...].astype(jnp.float32) + r_ref[...].astype(jnp.float32)
    mean = jnp.sum(x, axis=-1, keepdims=True) * inv_n
    xc = x - mean
    var = jnp.sum(xc * xc, axis=-1, keepdims=True) * inv_n
    inv = jax.lax.rsqrt(var + eps)
    o_ref[...] = (xc * inv * g_ref[...].astype(jnp.float32)
                  + b_ref[...].astype(jnp.float32)).astype(o_ref.dtype)


def add_layer_norm(x, r, gamma, beta, *, eps=1e-5):
    """LayerNorm(x + r) over the last axis; x, r: (..., fea)."""
    orig_shape = x.shape
    fea = orig_shape[-1]
    x2 = x.reshape(-1, fea)
    r2 = r.reshape(-1, fea)
    n_rows = x2.shape[0]

    # Row tile from a VMEM budget (3 streams, double-buffered, f32), conservative
    # for v7x's 64 MiB VMEM per TensorCore.
    budget = 18 * 1024 * 1024
    per_row = 3 * 2 * _round_up(fea, 128) * 4
    block_rows = max(8, min(512, (budget // per_row) // 8 * 8))
    n8 = _round_up(n_rows, 8)
    if n8 >= 16:
        block_rows = min(block_rows, max(8, (n8 // 2) // 8 * 8))   # >=2 grid steps (v7x)
    block_rows = min(block_rows, n8)
    n_pad = _round_up(n_rows, block_rows)
    if n_pad != n_rows:
        x2 = jnp.zeros((n_pad, fea), x.dtype).at[:n_rows].set(x2)
        r2 = jnp.zeros((n_pad, fea), r.dtype).at[:n_rows].set(r2)
    g2 = gamma.reshape(1, fea)
    b2 = beta.reshape(1, fea)

    vmem_limit = int(min(48 << 20, 3 * 2 * block_rows * fea * 4 + (8 << 20)))

    out = pl.pallas_call(
        functools.partial(_add_ln_kernel, eps=eps, inv_n=1.0 / float(fea)),
        out_shape=jax.ShapeDtypeStruct((n_pad, fea), x.dtype),
        grid=(n_pad // block_rows,),
        in_specs=[
            pl.BlockSpec((block_rows, fea), lambda i: (i, 0)),
            pl.BlockSpec((block_rows, fea), lambda i: (i, 0)),
            pl.BlockSpec((1, fea), lambda i: (0, 0)),
            pl.BlockSpec((1, fea), lambda i: (0, 0)),
        ],
        out_specs=pl.BlockSpec((block_rows, fea), lambda i: (i, 0)),
        compiler_params=pltpu.CompilerParams(
            dimension_semantics=("parallel",),
            vmem_limit_bytes=vmem_limit),
        cost_estimate=pl.CostEstimate(
            flops=int(10 * n_rows * fea),
            transcendentals=int(n_rows),
            bytes_accessed=int(3 * n_rows * fea * x.dtype.itemsize)),
    )(x2, r2, g2, b2)
    if n_pad != n_rows:
        out = out[:n_rows]
    return out.reshape(orig_shape)


# ----------------------------------------------------------------------------
# Kernel 3: fused pseudo-token multi-head attention core (all heads per batch)
# ----------------------------------------------------------------------------
def _attn_kernel(q_ref, k_ref, v_ref, rk_ref, b_ref, *rest,
                 scale, num_heads, dkq, dv, has_mask):
    if has_mask:
        m_ref, z_ref, s_ref = rest
    else:
        z_ref, s_ref = rest
    q_all = q_ref[0].astype(jnp.float32)           # (L, M*dkq), head-major
    k_all = k_ref[0].astype(jnp.float32)           # (P, M*dkq)
    v_all = v_ref[0].astype(jnp.float32)           # (P, M*dv)
    rk_all = rk_ref[0].astype(jnp.float32)         # (M, L, P)
    b_all = b_ref[0].astype(jnp.float32)           # (M, L, P) = relB (+ prevScores)
    if has_mask:
        m_all = m_ref[0].astype(jnp.float32)       # (M, L, P) dropout keep-mask
    for h in range(num_heads):                     # static unroll over heads
        q = q_all[:, h * dkq:(h + 1) * dkq]        # (L, dkq)
        k = k_all[:, h * dkq:(h + 1) * dkq]        # (P, dkq)
        v = v_all[:, h * dv:(h + 1) * dv]          # (P, dv)
        s = jax.lax.dot_general(q, k, (((1,), (1,)), ((), ())),
                                preferred_element_type=jnp.float32) * scale   # (L, P)
        s = s * rk_all[h] + b_all[h]
        s_ref[0, h] = s.astype(s_ref.dtype)
        e = jnp.exp(s - jnp.max(s, axis=-1, keepdims=True))
        alpha = e * pl.reciprocal(jnp.sum(e, axis=-1, keepdims=True), approx=True)
        if has_mask:
            alpha = alpha * m_all[h]
        z_ref[0, :, h * dv:(h + 1) * dv] = jnp.dot(
            alpha, v, preferred_element_type=jnp.float32).astype(z_ref.dtype)


def pseudo_attention(q, k, v, rel_k, bias, keep_mask, *, dk, num_heads):
    """q:(B,L,M*dkq) k:(B,P,M*dkq) v:(B,P,M*dk)  (head-major folded last axes)
    rel_k, bias:(B,M,L,P); keep_mask: None (eval) or (B,M,L,P).
    Returns z:(B,L,M*dk) (layout WO consumes) and scores:(B,M,L,P)."""
    B, L, dq_tot = q.shape
    P = k.shape[1]
    dv_tot = v.shape[2]
    M = num_heads
    dkq = dq_tot // M
    dv = dv_tot // M
    has_mask = keep_mask is not None

    def spec3(d1, d2):
        return pl.BlockSpec((1, d1, d2), lambda i: (i, 0, 0))

    def spec4():
        return pl.BlockSpec((1, M, L, P), lambda i: (i, 0, 0, 0))

    in_specs = [spec3(L, dq_tot), spec3(P, dq_tot), spec3(P, dv_tot), spec4(), spec4()]
    inputs = [q, k, v, rel_k, bias]
    if has_mask:
        in_specs.append(spec4())
        inputs.append(keep_mask)

    blk_bytes = 4 * (L * dq_tot + P * dq_tot + P * dv_tot
                     + (3 + int(has_mask)) * M * L * P + L * dv_tot)
    vmem_limit = int(min(48 << 20, 2 * blk_bytes + (8 << 20)))

    z, s = pl.pallas_call(
        functools.partial(_attn_kernel, scale=1.0 / math.sqrt(dk),
                          num_heads=M, dkq=dkq, dv=dv, has_mask=has_mask),
        out_shape=(jax.ShapeDtypeStruct((B, L, dv_tot), q.dtype),
                   jax.ShapeDtypeStruct((B, M, L, P), jnp.float32)),
        grid=(B,),
        in_specs=in_specs,
        out_specs=(spec3(L, dv_tot), spec4()),
        compiler_params=pltpu.CompilerParams(
            dimension_semantics=("parallel",),
            vmem_limit_bytes=vmem_limit),
        cost_estimate=pl.CostEstimate(
            flops=int(2 * B * M * L * P * (dkq + dv)),
            transcendentals=int(B * M * L * P),
            bytes_accessed=int(B * blk_bytes)),
    )(*inputs)
    return z, s


# ----------------------------------------------------------------------------
# Glue (small ops left to XLA) + full module forward
# ----------------------------------------------------------------------------
def _dropout(key, x, p, training):
    if (not training) or p <= 0.0:
        return x
    if p >= 1.0:
        return jnp.zeros_like(x)
    keep = jax.random.bernoulli(key, 1.0 - p, x.shape)
    return jnp.where(keep, x / (1.0 - p), 0.0)


def _dropout_mask(key, shape, p, training):
    if (not training) or p <= 0.0:
        return None                               # eval: drop the mask stream entirely
    keep = jax.random.bernoulli(key, 1.0 - p, shape)
    return keep.astype(jnp.float32) / (1.0 - p)


def _relative_pos(L, max_rel, emb_k, emb_b, p_alpha):
    idx = jnp.arange(L)
    d = jnp.abs(idx[:, None] - idx[None, :]).astype(jnp.float32)
    d = jnp.where(d > max_rel,
                  max_rel + jnp.log2(jnp.maximum(d - max_rel, 1.0)), d)
    tab = jnp.clip(d, 0, 2 * max_rel).astype(jnp.int32)              # (L, L)
    k4 = jnp.transpose(emb_k[tab], (2, 1, 0))[None]                  # (1, M, L, L)
    b4 = jnp.transpose(emb_b[tab], (2, 1, 0))[None]
    # TODO(synk): tiny (M,L,L)x(B,L,P) batched matmuls left to XLA einsum/matmul.
    return jnp.matmul(k4, p_alpha[:, None, :, :]), jnp.matmul(b4, p_alpha[:, None, :, :])


def self_attention_forward(p, qx, kx, vx, pre_scores, mask_pad, cfg, training, keys):
    B, L, C = qx.shape
    P, M, dk, dkE = cfg["pseudoTknNum"], cfg["multiNum"], cfg["dk"], cfg["dkEnhance"]

    p_score = linear(vx, p["pseudoAttn_w"], p["pseudoAttn_b"])        # (B, L, P)
    if pre_scores is not None:
        p_score = p_score + pre_scores[0]
    if mask_pad is not None:
        p_score = jnp.where((mask_pad[:, 0] == 0)[..., None], -2.0 ** 15, p_score)
    p_alpha = jax.nn.softmax(p_score, axis=1)
    p_alpha = _dropout(keys[0], p_alpha, cfg["dropout"], training)
    # TODO(synk): small pseudo-token contractions (B,P,L)x(B,L,C) left to XLA einsum.
    kxc = jnp.einsum("blp,blc->bpc", p_alpha, kx)
    vxc = jnp.einsum("blp,blc->bpc", p_alpha, vx)

    # Head-major folded layouts: no (0,2,1,3) transposes are needed anywhere.
    queries = linear(qx, p["WQ_w"], p["WQ_b"])       # (B, L, M*dk*dkE)
    keys_t = linear(kxc, p["WK_w"], p["WK_b"])       # (B, P, M*dk*dkE)
    values = linear(vxc, p["WV_w"], p["WV_b"])       # (B, P, M*dk)

    if cfg["maxRelativeDist"] > 0:
        k_mat, b_mat = _relative_pos(L, cfg["maxRelativeDist"], p["relK"], p["relB"], p_alpha)
    else:
        k_mat = jnp.ones((B, M, L, P), jnp.float32)
        b_mat = jnp.zeros((B, M, L, P), jnp.float32)
    bias = b_mat if pre_scores is None else b_mat + pre_scores[1]     # fold prevScores
    keep = _dropout_mask(keys[1], (B, M, L, P), cfg["dropout"], training)

    z, scores = pseudo_attention(queries, keys_t, values, k_mat, bias, keep,
                                 dk=dk, num_heads=M)                  # z: (B, L, M*dk)
    z = linear(z, p["WO_w"], p["WO_b"])
    return z, (p_score, scores)


def ffn_forward(p, x, z, cfg, training, keys):
    z_d = _dropout(keys[0], z, cfg["dropout"], training)
    z1 = add_layer_norm(x, z_d, p["ln1_g"], p["ln1_b"])
    h = linear(z1, p["ffn1_w"], p["ffn1_b"], activation="gelu")
    h = _dropout(keys[1], h, cfg["dropout"], training)
    ffnx = linear(h, p["ffn2_w"], p["ffn2_b"])
    ffnx_d = _dropout(keys[2], ffnx, cfg["dropout"], training)
    return add_layer_norm(z1, ffnx_d, p["ln2_g"], p["ln2_b"])


def transformer_layers_pseudoformer(params, x, mask_pad, cfg, *, training=False, rng=None):
    if training and rng is None:
        rng = jax.random.PRNGKey(0)
    qx = kx = vx = x
    pre_scores = None
    for p in params:
        if training:
            rng, sub = jax.random.split(rng)
            keys = list(jax.random.split(sub, 5))
        else:
            keys = [None] * 5
        z, pre_scores = self_attention_forward(p, qx, kx, vx, pre_scores, mask_pad,
                                               cfg, training, keys[:2])
        out = ffn_forward(p, vx, z, cfg, training, keys[2:])
        qx = kx = vx = out
    return qx, kx, vx, pre_scores, mask_pad


# ----------------------------------------------------------------------------
# Parameter init (mirrors _reset_parameters) + one-time bf16 weight prep
# ----------------------------------------------------------------------------
def init_params(key, cfg):
    fea, dk, M, P = cfg["feaSize"], cfg["dk"], cfg["multiNum"], cfg["pseudoTknNum"]
    dkE, max_rel = cfg["dkEnhance"], cfg["maxRelativeDist"]

    def trunc(k, shape, std=0.02):
        return std * jax.random.truncated_normal(k, -2.0, 2.0, shape, jnp.float32)

    params = []
    for _ in range(cfg["layersNum"]):
        key, *ks = jax.random.split(key, 12)
        params.append(dict(
            pseudoAttn_w=trunc(ks[0], (fea, P)), pseudoAttn_b=jnp.zeros((P,), jnp.float32),
            WQ_w=trunc(ks[1], (fea, dkE * dk * M)), WQ_b=jnp.zeros((dkE * dk * M,), jnp.float32),
            WK_w=trunc(ks[2], (fea, dkE * dk * M)), WK_b=jnp.zeros((dkE * dk * M,), jnp.float32),
            WV_w=trunc(ks[3], (fea, dk * M)), WV_b=jnp.zeros((dk * M,), jnp.float32),
            WO_w=trunc(ks[4], (dk * M, fea)), WO_b=jnp.zeros((fea,), jnp.float32),
            relK=trunc(ks[5], (2 * max_rel + 1, M)), relB=trunc(ks[6], (2 * max_rel + 1, M)),
            ln1_g=jnp.ones((fea,), jnp.float32), ln1_b=jnp.zeros((fea,), jnp.float32),
            ln2_g=jnp.ones((fea,), jnp.float32), ln2_b=jnp.zeros((fea,), jnp.float32),
            ffn1_w=trunc(ks[7], (fea, 4 * fea)), ffn1_b=jnp.zeros((4 * fea,), jnp.float32),
            ffn2_w=trunc(ks[8], (4 * fea, fea)), ffn2_b=jnp.zeros((fea,), jnp.float32),
        ))
    return params


_MXU_WEIGHTS = ("pseudoAttn_w", "WQ_w", "WK_w", "WV_w", "WO_w", "ffn1_w", "ffn2_w")


def prepare_params(params):
    """Pre-cast matmul weights to bf16 once (MXU-native, halves weight HBM traffic)."""
    prepped = []
    for p in params:
        q = dict(p)
        for name in _MXU_WEIGHTS:
            q[name] = p[name].astype(jnp.bfloat16)
        prepped.append(q)
    return prepped


# ----------------------------------------------------------------------------
# Pure-JAX reference (eval mode) for the numeric check
# ----------------------------------------------------------------------------
def _ref_layer_norm(x, g, b, eps=1e-5):
    m = jnp.mean(x, axis=-1, keepdims=True)
    v = jnp.mean((x - m) ** 2, axis=-1, keepdims=True)
    return (x - m) / jnp.sqrt(v + eps) * g + b


def _ref_forward(params, x, mask_pad, cfg):
    qx = kx = vx = x
    pre_scores = None
    P, M, dk, dkE = cfg["pseudoTknNum"], cfg["multiNum"], cfg["dk"], cfg["dkEnhance"]
    for p in params:
        B, L, C = qx.shape
        p_score = vx @ p["pseudoAttn_w"] + p["pseudoAttn_b"]
        if pre_scores is not None:
            p_score = p_score + pre_scores[0]
        if mask_pad is not None:
            p_score = jnp.where((mask_pad[:, 0] == 0)[..., None], -2.0 ** 15, p_score)
        p_alpha = jax.nn.softmax(p_score, axis=1)
        kxc = jnp.einsum("blp,blc->bpc", p_alpha, kx)
        vxc = jnp.einsum("blp,blc->bpc", p_alpha, vx)
        queries = (qx @ p["WQ_w"] + p["WQ_b"]).reshape(B, L, M, dk * dkE).transpose(0, 2, 1, 3)
        keys_t = (kxc @ p["WK_w"] + p["WK_b"]).reshape(B, P, M, dk * dkE).transpose(0, 2, 1, 3)
        values = (vxc @ p["WV_w"] + p["WV_b"]).reshape(B, P, M, dk).transpose(0, 2, 1, 3)
        scores = jnp.einsum("bmld,bmpd->bmlp", queries, keys_t) / math.sqrt(dk)
        if cfg["maxRelativeDist"] > 0:
            k_mat, b_mat = _relative_pos(L, cfg["maxRelativeDist"], p["relK"], p["relB"], p_alpha)
            scores = scores * k_mat + b_mat
        if pre_scores is not None:
            scores = scores + pre_scores[1]
        alpha = jax.nn.softmax(scores, axis=3)
        z = jnp.einsum("bmlp,bmpd->bmld", alpha, values)
        z = z.transpose(0, 2, 1, 3).reshape(B, L, M * dk)
        z = z @ p["WO_w"] + p["WO_b"]
        pre_scores = (p_score, scores)
        z1 = _ref_layer_norm(vx + z, p["ln1_g"], p["ln1_b"])
        h = _gelu_tanh(z1 @ p["ffn1_w"] + p["ffn1_b"])
        ffnx = h @ p["ffn2_w"] + p["ffn2_b"]
        out = _ref_layer_norm(z1 + ffnx, p["ln2_g"], p["ln2_b"])
        qx = kx = vx = out
    return qx, pre_scores


# ----------------------------------------------------------------------------
if __name__ == "__main__":
    cfg = dict(layersNum=2, feaSize=32, dk=8, multiNum=4, pseudoTknNum=4,
               maxRelativeDist=7, dkEnhance=1, dropout=0.1)
    B, L = 2, 8

    root = jax.random.PRNGKey(0)
    k_param, k_x = jax.random.split(root)
    params = init_params(k_param, cfg)            # f32 master params (used by reference)
    run_params = prepare_params(params)           # bf16 weights for the MXU kernels
    x = jax.random.normal(k_x, (B, L, cfg["feaSize"]), jnp.float32)

    mask_pad = jnp.ones((B, L, L), jnp.int32)
    mask_pad = mask_pad.at[1, :, 6:].set(0).at[1, 6:, :].set(0)   # pad last 2 tokens of batch 1

    # ---- eval-mode forward (Pallas kernels, jitted) vs pure-JAX reference ----
    fwd_eval = jax.jit(lambda prm, xx, mp: transformer_layers_pseudoformer(
        prm, xx, mp, cfg, training=False))
    qx, kx_o, vx_o, pre_scores, _ = fwd_eval(run_params, x, mask_pad)
    qx, pre_scores = jax.block_until_ready((qx, pre_scores))

    ref_out, ref_scores = _ref_forward(params, x, mask_pad, cfg)
    ref_out = jax.block_until_ready(ref_out)

    assert qx.shape == x.shape and qx.dtype == x.dtype
    max_diff = float(jnp.max(jnp.abs(qx - ref_out)))
    assert jnp.allclose(qx, ref_out, atol=3e-2, rtol=3e-2), f"output mismatch {max_diff}"
    assert jnp.allclose(pre_scores[1], ref_scores[1], atol=3e-2, rtol=3e-2), "scores mismatch"

    # ---- training-mode smoke run (dropout via wrapper-generated jax.random masks) ----
    fwd_train = jax.jit(lambda prm, xx, mp, key: transformer_layers_pseudoformer(
        prm, xx, mp, cfg, training=True, rng=key))
    tr_out = fwd_train(run_params, x, mask_pad, jax.random.PRNGKey(123))[0]
    tr_out = jax.block_until_ready(tr_out)
    assert tr_out.shape == x.shape and bool(jnp.all(jnp.isfinite(tr_out)))

    print("KERNEL_OK")
</pallas_src>

<mosaic_0001>
module attributes {stable_mosaic.version = 11 : i64} {
  func.func @_linear_kernel(%arg0: i32, %arg1: i32, %arg2: memref<8x32xf32, #tpu.memory_space<vmem>>, %arg3: memref<32x4xbf16, #tpu.memory_space<vmem>>, %arg4: memref<1x4xf32, #tpu.memory_space<vmem>>, %arg5: memref<8x4xf32, #tpu.memory_space<vmem>>) attributes {dimension_semantics = [#tpu.dimension_semantics<parallel>, #tpu.dimension_semantics<parallel>], iteration_bounds = array<i64: 2, 1>, scalar_prefetch = 0 : i64, scratch_operands = 0 : i64, tpu.core_type = #tpu.core_type<tc>, window_params = [{transform_indices = @transform_0, window_bounds = array<i64: 8, 32>}, {transform_indices = @transform_1, window_bounds = array<i64: 32, 4>}, {transform_indices = @transform_2, window_bounds = array<i64: 1, 4>}, {transform_indices = @transform_3, window_bounds = array<i64: 8, 4>}]} {
    %c0 = arith.constant 0 : index
    %c0_0 = arith.constant 0 : index
    %0 = vector.load %arg2[%c0, %c0_0] : memref<8x32xf32, #tpu.memory_space<vmem>>, vector<8x32xf32>
    %1 = arith.truncf %0 : vector<8x32xf32> to vector<8x32xbf16>
    %c0_1 = arith.constant 0 : index
    %c0_2 = arith.constant 0 : index
    %2 = vector.load %arg3[%c0_1, %c0_2] : memref<32x4xbf16, #tpu.memory_space<vmem>>, vector<32x4xbf16>
    %cst = arith.constant dense<0.000000e+00> : vector<8x4xf32>
    %3 = tpu.matmul %1, %2, %cst {dimension_numbers = #tpu.dot_dimension_numbers<[1], [0], [0], [1], [0, 0, 1, 1], [], []>} : vector<8x32xbf16>, vector<32x4xbf16>, vector<8x4xf32> -> vector<8x4xf32>
    %c0_3 = arith.constant 0 : index
    %c0_4 = arith.constant 0 : index
    %4 = vector.load %arg4[%c0_3, %c0_4] : memref<1x4xf32, #tpu.memory_space<vmem>>, vector<1x4xf32>
    %5 = vector.broadcast %4 : vector<1x4xf32> to vector<8x4xf32>
    %6 = arith.addf %3, %5 : vector<8x4xf32>
    %c0_5 = arith.constant 0 : index
    %c0_6 = arith.constant 0 : index
    %7 = vector.load %arg5[%c0_5, %c0_6] : memref<8x4xf32, #tpu.memory_space<vmem>>, vector<8x4xf32>
    tpu.vector_store %arg5[%c0_5, %c0_6], %6 {strides = array<i32>} : memref<8x4xf32, #tpu.memory_space<vmem>>, vector<8x4xf32>,
    return
  }
  func.func @transform_0(%arg0: i32, %arg1: i32) -> (i32, i32) {
    %c0_i32 = arith.constant 0 : i32
    %c0_i32_0 = arith.constant 0 : i32
    return %arg0, %c0_i32 : i32, i32
  }
  func.func @transform_1(%arg0: i32, %arg1: i32) -> (i32, i32) {
    %c0_i32 = arith.constant 0 : i32
    %c0_i32_0 = arith.constant 0 : i32
    return %c0_i32, %arg1 : i32, i32
  }
  func.func @transform_2(%arg0: i32, %arg1: i32) -> (i32, i32) {
    %c0_i32 = arith.constant 0 : i32
    %c0_i32_0 = arith.constant 0 : i32
    return %c0_i32, %arg1 : i32, i32
  }
  func.func @transform_3(%arg0: i32, %arg1: i32) -> (i32, i32) {
    %c0_i32 = arith.constant 0 : i32
    return %arg0, %arg1 : i32, i32
  }
}

module attributes {stable_mosaic.version = 11 : i64} {
  func.func @_linear_kernel(%arg0: i32, %arg1: i32, %arg2: memref<8x32xf32, #tpu.memory_space<vmem>>, %arg3: memref<32x32xbf16, #tpu.memory_space<vmem>>, %arg4: memref<1x32xf32, #tpu.memory_space<vmem>>, %arg5: memref<8x32xf32, #tpu.memory_space<vmem>>) attributes {dimension_semantics = [#tpu.dimension_semantics<parallel>, #tpu.dimension_semantics<parallel>], iteration_bounds = array<i64: 1, 1>, scalar_prefetch = 0 : i64, scratch_operands = 0 : i64, tpu.core_type = #tpu.core_type<tc>, window_params = [{transform_indices = @transform_0, window_bounds = array<i64: 8, 32>}, {transform_indices = @transform_1, window_bounds = array<i64: 32, 32>}, {transform_indices = @transform_2, window_bounds = array<i64: 1, 32>}, {transform_indices = @transform_3, window_bounds = array<i64: 8, 32>}]} {
    %c0 = arith.constant 0 : index
    %c0_0 = arith.constant 0 : index
    %0 = vector.load %arg2[%c0, %c0_0] : memref<8x32xf32, #tpu.memory_space<vmem>>, vector<8x32xf32>
    %1 = arith.truncf %0 : vector<8x32xf32> to vector<8x32xbf16>
    %c0_1 = arith.constant 0 : index
    %c0_2 = arith.constant 0 : index
    %2 = vector.load %arg3[%c0_1, %c0_2] : memref<32x32xbf16, #tpu.memory_space<vmem>>, vector<32x32xbf16>
    %cst = arith.constant dense<0.000000e+00> : vector<8x32xf32>
    %3 = tpu.matmul %1, %2, %cst {dimension_numbers = #tpu.dot_dimension_numbers<[1], [0], [0], [1], [0, 0, 1, 1], [], []>} : vector<8x32xbf16>, vector<32x32xbf16>, vector<8x32xf32> -> vector<8x32xf32>
    %c0_3 = arith.constant 0 : index
    %c0_4 = arith.constant 0 : index
    %4 = vector.load %arg4[%c0_3, %c0_4] : memref<1x32xf32, #tpu.memory_space<vmem>>, vector<1x32xf32>
    %5 = vector.broadcast %4 : vector<1x32xf32> to vector<8x32xf32>
    %6 = arith.addf %3, %5 : vector<8x32xf32>
    %c0_5 = arith.constant 0 : index
    %c0_6 = arith.constant 0 : index
    %7 = vector.load %arg5[%c0_5, %c0_6] : memref<8x32xf32, #tpu.memory_space<vmem>>, vector<8x32xf32>
    tpu.vector_store %arg5[%c0_5, %c0_6], %6 {strides = array<i32>} : memref<8x32xf32, #tpu.memory_space<vmem>>, vector<8x32xf32>,
    return
  }
  func.func @transform_0(%arg0: i32, %arg1: i32) -> (i32, i32) {
    %c0_i32 = arith.constant 0 : i32
    %c0_i32_0 = arith.constant 0 : i32
    return %arg0, %c0_i32 : i32, i32
  }
  func.func @transform_1(%arg0: i32, %arg1: i32) -> (i32, i32) {
    %c0_i32 = arith.constant 0 : i32
    %c0_i32_0 = arith.constant 0 : i32
    return %c0_i32, %arg1 : i32, i32
  }
  func.func @transform_2(%arg0: i32, %arg1: i32) -> (i32, i32) {
    %c0_i32 = arith.constant 0 : i32
    %c0_i32_0 = arith.constant 0 : i32
    return %c0_i32, %arg1 : i32, i32
  }
  func.func @transform_3(%arg0: i32, %arg1: i32) -> (i32, i32) {
    %c0_i32 = arith.constant 0 : i32
    return %arg0, %arg1 : i32, i32
  }
}

module attributes {stable_mosaic.version = 11 : i64} {
  func.func @_linear_kernel(%arg0: i32, %arg1: i32, %arg2: memref<8x32xf32, #tpu.memory_space<vmem>>, %arg3: memref<32x32xbf16, #tpu.memory_space<vmem>>, %arg4: memref<1x32xf32, #tpu.memory_space<vmem>>, %arg5: memref<8x32xf32, #tpu.memory_space<vmem>>) attributes {dimension_semantics = [#tpu.dimension_semantics<parallel>, #tpu.dimension_semantics<parallel>], iteration_bounds = array<i64: 2, 1>, scalar_prefetch = 0 : i64, scratch_operands = 0 : i64, tpu.core_type = #tpu.core_type<tc>, window_params = [{transform_indices = @transform_0, window_bounds = array<i64: 8, 32>}, {transform_indices = @transform_1, window_bounds = array<i64: 32, 32>}, {transform_indices = @transform_2, window_bounds = array<i64: 1, 32>}, {transform_indices = @transform_3, window_bounds = array<i64: 8, 32>}]} {
    %c0 = arith.constant 0 : index
    %c0_0 = arith.constant 0 : index
    %0 = vector.load %arg2[%c0, %c0_0] : memref<8x32xf32, #tpu.memory_space<vmem>>, vector<8x32xf32>
    %1 = arith.truncf %0 : vector<8x32xf32> to vector<8x32xbf16>
    %c0_1 = arith.constant 0 : index
    %c0_2 = arith.constant 0 : index
    %2 = vector.load %arg3[%c0_1, %c0_2] : memref<32x32xbf16, #tpu.memory_space<vmem>>, vector<32x32xbf16>
    %cst = arith.constant dense<0.000000e+00> : vector<8x32xf32>
    %3 = tpu.matmul %1, %2, %cst {dimension_numbers = #tpu.dot_dimension_numbers<[1], [0], [0], [1], [0, 0, 1, 1], [], []>} : vector<8x32xbf16>, vector<32x32xbf16>, vector<8x32xf32> -> vector<8x32xf32>
    %c0_3 = arith.constant 0 : index
    %c0_4 = arith.constant 0 : index
    %4 = vector.load %arg4[%c0_3, %c0_4] : memref<1x32xf32, #tpu.memory_space<vmem>>, vector<1x32xf32>
    %5 = vector.broadcast %4 : vector<1x32xf32> to vector<8x32xf32>
    %6 = arith.addf %3, %5 : vector<8x32xf32>
    %c0_5 = arith.constant 0 : index
    %c0_6 = arith.constant 0 : index
    %7 = vector.load %arg5[%c0_5, %c0_6] : memref<8x32xf32, #tpu.memory_space<vmem>>, vector<8x32xf32>
    tpu.vector_store %arg5[%c0_5, %c0_6], %6 {strides = array<i32>} : memref<8x32xf32, #tpu.memory_space<vmem>>, vector<8x32xf32>,
    return
  }
  func.func @transform_0(%arg0: i32, %arg1: i32) -> (i32, i32) {
    %c0_i32 = arith.constant 0 : i32
    %c0_i32_0 = arith.constant 0 : i32
    return %arg0, %c0_i32 : i32, i32
  }
  func.func @transform_1(%arg0: i32, %arg1: i32) -> (i32, i32) {
    %c0_i32 = arith.constant 0 : i32
    %c0_i32_0 = arith.constant 0 : i32
    return %c0_i32, %arg1 : i32, i32
  }
  func.func @transform_2(%arg0: i32, %arg1: i32) -> (i32, i32) {
    %c0_i32 = arith.constant 0 : i32
    %c0_i32_0 = arith.constant 0 : i32
    return %c0_i32, %arg1 : i32, i32
  }
  func.func @transform_3(%arg0: i32, %arg1: i32) -> (i32, i32) {
    %c0_i32 = arith.constant 0 : i32
    return %arg0, %arg1 : i32, i32
  }
}

module attributes {stable_mosaic.version = 11 : i64} {
  func.func @_add_ln_kernel(%arg0: i32, %arg1: memref<8x32xf32, #tpu.memory_space<vmem>>, %arg2: memref<8x32xf32, #tpu.memory_space<vmem>>, %arg3: memref<1x32xf32, #tpu.memory_space<vmem>>, %arg4: memref<1x32xf32, #tpu.memory_space<vmem>>, %arg5: memref<8x32xf32, #tpu.memory_space<vmem>>) attributes {dimension_semantics = [#tpu.dimension_semantics<parallel>], iteration_bounds = array<i64: 2>, scalar_prefetch = 0 : i64, scratch_operands = 0 : i64, tpu.core_type = #tpu.core_type<tc>, window_params = [{transform_indices = @transform_0, window_bounds = array<i64: 8, 32>}, {transform_indices = @transform_1, window_bounds = array<i64: 8, 32>}, {pipeline_mode = #tpu.pipeline_mode<synchronous>, transform_indices = @transform_2, window_bounds = array<i64: 1, 32>}, {pipeline_mode = #tpu.pipeline_mode<synchronous>, transform_indices = @transform_3, window_bounds = array<i64: 1, 32>}, {transform_indices = @transform_4, window_bounds = array<i64: 8, 32>}]} {
    %c0 = arith.constant 0 : index
    %c0_0 = arith.constant 0 : index
    %0 = vector.load %arg1[%c0, %c0_0] : memref<8x32xf32, #tpu.memory_space<vmem>>, vector<8x32xf32>
    %c0_1 = arith.constant 0 : index
    %c0_2 = arith.constant 0 : index
    %1 = vector.load %arg2[%c0_1, %c0_2] : memref<8x32xf32, #tpu.memory_space<vmem>>, vector<8x32xf32>
    %2 = arith.addf %0, %1 : vector<8x32xf32>
    %cst = arith.constant dense<0.000000e+00> : vector<8xf32>
    %3 = vector.multi_reduction <add>, %2, %cst [1] : vector<8x32xf32> to vector<8xf32>
    %4 = vector.shape_cast %3 : vector<8xf32> to vector<8x1xf32>
    %cst_3 = arith.constant 3.125000e-02 : f32
    %5 = vector.broadcast %cst_3 : f32 to vector<8x1xf32>
    %6 = arith.mulf %4, %5 : vector<8x1xf32>
    %7 = vector.broadcast %6 : vector<8x1xf32> to vector<8x32xf32>
    %8 = arith.subf %2, %7 : vector<8x32xf32>
    %9 = arith.mulf %8, %8 : vector<8x32xf32>
    %cst_4 = arith.constant dense<0.000000e+00> : vector<8xf32>
    %10 = vector.multi_reduction <add>, %9, %cst_4 [1] : vector<8x32xf32> to vector<8xf32>
    %11 = vector.shape_cast %10 : vector<8xf32> to vector<8x1xf32>
    %cst_5 = arith.constant 3.125000e-02 : f32
    %12 = vector.broadcast %cst_5 : f32 to vector<8x1xf32>
    %13 = arith.mulf %11, %12 : vector<8x1xf32>
    %cst_6 = arith.constant 9.99999974E-6 : f32
    %14 = vector.broadcast %cst_6 : f32 to vector<8x1xf32>
    %15 = arith.addf %13, %14 : vector<8x1xf32>
    %16 = math.rsqrt %15 : vector<8x1xf32>
    %17 = vector.broadcast %16 : vector<8x1xf32> to vector<8x32xf32>
    %18 = arith.mulf %8, %17 : vector<8x32xf32>
    %c0_7 = arith.constant 0 : index
    %c0_8 = arith.constant 0 : index
    %19 = vector.load %arg3[%c0_7, %c0_8] : memref<1x32xf32, #tpu.memory_space<vmem>>, vector<1x32xf32>
    %20 = vector.broadcast %19 : vector<1x32xf32> to vector<8x32xf32>
    %21 = arith.mulf %18, %20 : vector<8x32xf32>
    %c0_9 = arith.constant 0 : index
    %c0_10 = arith.constant 0 : index
    %22 = vector.load %arg4[%c0_9, %c0_10] : memref<1x32xf32, #tpu.memory_space<vmem>>, vector<1x32xf32>
    %23 = vector.broadcast %22 : vector<1x32xf32> to vector<8x32xf32>
    %24 = arith.addf %21, %23 : vector<8x32xf32>
    %c0_11 = arith.constant 0 : index
    %c0_12 = arith.constant 0 : index
    %25 = vector.load %arg5[%c0_11, %c0_12] : memref<8x32xf32, #tpu.memory_space<vmem>>, vector<8x32xf32>
    tpu.vector_store %arg5[%c0_11, %c0_12], %24 {strides = array<i32>} : memref<8x32xf32, #tpu.memory_space<vmem>>, vector<8x32xf32>,
    return
  }
  func.func @transform_0(%arg0: i32) -> (i32, i32) {
    %c0_i32 = arith.constant 0 : i32
    %c0_i32_0 = arith.constant 0 : i32
    return %arg0, %c0_i32 : i32, i32
  }
  func.func @transform_1(%arg0: i32) -> (i32, i32) {
    %c0_i32 = arith.constant 0 : i32
    %c0_i32_0 = arith.constant 0 : i32
    return %arg0, %c0_i32 : i32, i32
  }
  func.func @transform_2(%arg0: i32) -> (i32, i32) {
    %c0_i32 = arith.constant 0 : i32
    %c0_i32_0 = arith.constant 0 : i32
    %c0_i32_1 = arith.constant 0 : i32
    return %c0_i32, %c0_i32_0 : i32, i32
  }
  func.func @transform_3(%arg0: i32) -> (i32, i32) {
    %c0_i32 = arith.constant 0 : i32
    %c0_i32_0 = arith.constant 0 : i32
    %c0_i32_1 = arith.constant 0 : i32
    return %c0_i32, %c0_i32_0 : i32, i32
  }
  func.func @transform_4(%arg0: i32) -> (i32, i32) {
    %c0_i32 = arith.constant 0 : i32
    %c0_i32_0 = arith.constant 0 : i32
    return %arg0, %c0_i32 : i32, i32
  }
}

module attributes {stable_mosaic.version = 11 : i64} {
  func.func @_attn_kernel(%arg0: i32, %arg1: memref<1x8x32xf32, #tpu.memory_space<vmem>>, %arg2: memref<1x4x32xf32, #tpu.memory_space<vmem>>, %arg3: memref<1x4x32xf32, #tpu.memory_space<vmem>>, %arg4: memref<1x4x8x4xf32, #tpu.memory_space<vmem>>, %arg5: memref<1x4x8x4xf32, #tpu.memory_space<vmem>>, %arg6: memref<1x8x32xf32, #tpu.memory_space<vmem>>, %arg7: memref<1x4x8x4xf32, #tpu.memory_space<vmem>>) attributes {dimension_semantics = [#tpu.dimension_semantics<parallel>], iteration_bounds = array<i64: 2>, scalar_prefetch = 0 : i64, scratch_operands = 0 : i64, tpu.core_type = #tpu.core_type<tc>, window_params = [{transform_indices = @transform_0, window_bounds = array<i64: 1, 8, 32>}, {transform_indices = @transform_1, window_bounds = array<i64: 1, 4, 32>}, {transform_indices = @transform_2, window_bounds = array<i64: 1, 4, 32>}, {transform_indices = @transform_3, window_bounds = array<i64: 1, 4, 8, 4>}, {transform_indices = @transform_4, window_bounds = array<i64: 1, 4, 8, 4>}, {transform_indices = @transform_5, window_bounds = array<i64: 1, 8, 32>}, {transform_indices = @transform_6, window_bounds = array<i64: 1, 4, 8, 4>}]} {
    %c0 = arith.constant 0 : index
    %c0_0 = arith.constant 0 : index
    %c0_1 = arith.constant 0 : index
    %0 = vector.load %arg1[%c0, %c0_0, %c0_1] : memref<1x8x32xf32, #tpu.memory_space<vmem>>, vector<1x8x32xf32>
    %1 = vector.shape_cast %0 : vector<1x8x32xf32> to vector<8x32xf32>
    %c0_2 = arith.constant 0 : index
    %c0_3 = arith.constant 0 : index
    %c0_4 = arith.constant 0 : index
    %2 = vector.load %arg2[%c0_2, %c0_3, %c0_4] : memref<1x4x32xf32, #tpu.memory_space<vmem>>, vector<1x4x32xf32>
    %3 = vector.shape_cast %2 : vector<1x4x32xf32> to vector<4x32xf32>
    %c0_5 = arith.constant 0 : index
    %c0_6 = arith.constant 0 : index
    %c0_7 = arith.constant 0 : index
    %4 = vector.load %arg3[%c0_5, %c0_6, %c0_7] : memref<1x4x32xf32, #tpu.memory_space<vmem>>, vector<1x4x32xf32>
    %5 = vector.shape_cast %4 : vector<1x4x32xf32> to vector<4x32xf32>
    %c0_8 = arith.constant 0 : index
    %c0_9 = arith.constant 0 : index
    %c0_10 = arith.constant 0 : index
    %c0_11 = arith.constant 0 : index
    %6 = vector.load %arg4[%c0_8, %c0_9, %c0_10, %c0_11] : memref<1x4x8x4xf32, #tpu.memory_space<vmem>>, vector<1x4x8x4xf32>
    %7 = vector.shape_cast %6 : vector<1x4x8x4xf32> to vector<4x8x4xf32>
    %c0_12 = arith.constant 0 : index
    %c0_13 = arith.constant 0 : index
    %c0_14 = arith.constant 0 : index
    %c0_15 = arith.constant 0 : index
    %8 = vector.load %arg5[%c0_12, %c0_13, %c0_14, %c0_15] : memref<1x4x8x4xf32, #tpu.memory_space<vmem>>, vector<1x4x8x4xf32>
    %9 = vector.shape_cast %8 : vector<1x4x8x4xf32> to vector<4x8x4xf32>
    %10 = vector.extract_strided_slice %1 {offsets = [0, 0], sizes = [8, 8], strides = [1, 1]} : vector<8x32xf32> to vector<8x8xf32>
    %11 = vector.extract_strided_slice %3 {offsets = [0, 0], sizes = [4, 8], strides = [1, 1]} : vector<4x32xf32> to vector<4x8xf32>
    %12 = vector.extract_strided_slice %5 {offsets = [0, 0], sizes = [4, 8], strides = [1, 1]} : vector<4x32xf32> to vector<4x8xf32>
    %cst = arith.constant dense<0.000000e+00> : vector<8x4xf32>
    %13 = tpu.matmul %10, %11, %cst {dimension_numbers = #tpu.dot_dimension_numbers<[1], [1], [0], [0], [0, 0, 1, 0], [], []>} : vector<8x8xf32>, vector<4x8xf32>, vector<8x4xf32> -> vector<8x4xf32>
    %cst_16 = arith.constant 0.353553385 : f32
    %14 = vector.broadcast %cst_16 : f32 to vector<8x4xf32>
    %15 = arith.mulf %13, %14 : vector<8x4xf32>
    %16 = vector.extract_strided_slice %7 {offsets = [0, 0, 0], sizes = [1, 8, 4], strides = [1, 1, 1]} : vector<4x8x4xf32> to vector<1x8x4xf32>
    %17 = vector.shape_cast %16 : vector<1x8x4xf32> to vector<8x4xf32>
    %18 = arith.mulf %15, %17 : vector<8x4xf32>
    %19 = vector.extract_strided_slice %9 {offsets = [0, 0, 0], sizes = [1, 8, 4], strides = [1, 1, 1]} : vector<4x8x4xf32> to vector<1x8x4xf32>
    %20 = vector.shape_cast %19 : vector<1x8x4xf32> to vector<8x4xf32>
    %21 = arith.addf %18, %20 : vector<8x4xf32>
    %c0_17 = arith.constant 0 : index
    %c0_18 = arith.constant 0 : index
    %c0_19 = arith.constant 0 : index
    %c0_20 = arith.constant 0 : index
    %22 = vector.load %arg7[%c0_17, %c0_18, %c0_19, %c0_20] : memref<1x4x8x4xf32, #tpu.memory_space<vmem>>, vector<1x1x8x4xf32>
    %23 = vector.shape_cast %22 : vector<1x1x8x4xf32> to vector<8x4xf32>
    %24 = vector.shape_cast %21 : vector<8x4xf32> to vector<1x1x8x4xf32>
    tpu.vector_store %arg7[%c0_17, %c0_18, %c0_19, %c0_20], %24 {strides = array<i32>} : memref<1x4x8x4xf32, #tpu.memory_space<vmem>>, vector<1x1x8x4xf32>,
    %cst_21 = arith.constant dense<0xFF800000> : vector<8xf32>
    %25 = vector.multi_reduction <maximumf>, %21, %cst_21 [1] : vector<8x4xf32> to vector<8xf32>
    %26 = vector.shape_cast %25 : vector<8xf32> to vector<8x1xf32>
    %27 = vector.broadcast %26 : vector<8x1xf32> to vector<8x4xf32>
    %28 = arith.subf %21, %27 : vector<8x4xf32>
    %29 = math.exp %28 : vector<8x4xf32>
    %cst_22 = arith.constant dense<0.000000e+00> : vector<8xf32>
    %30 = vector.multi_reduction <add>, %29, %cst_22 [1] : vector<8x4xf32> to vector<8xf32>
    %31 = vector.shape_cast %30 : vector<8xf32> to vector<8x1xf32>
    %32 = tpu.reciprocal %31 {approx = true} : vector<8x1xf32> -> vector<8x1xf32>
    %33 = vector.broadcast %32 : vector<8x1xf32> to vector<8x4xf32>
    %34 = arith.mulf %29, %33 : vector<8x4xf32>
    %cst_23 = arith.constant dense<0.000000e+00> : vector<8x8xf32>
    %35 = tpu.matmul %34, %12, %cst_23 {dimension_numbers = #tpu.dot_dimension_numbers<[1], [0], [0], [1], [0, 0, 1, 1], [], []>} : vector<8x4xf32>, vector<4x8xf32>, vector<8x8xf32> -> vector<8x8xf32>
    %c0_24 = arith.constant 0 : index
    %c0_25 = arith.constant 0 : index
    %c0_26 = arith.constant 0 : index
    %36 = vector.load %arg6[%c0_24, %c0_25, %c0_26] : memref<1x8x32xf32, #tpu.memory_space<vmem>>, vector<1x8x8xf32>
    %37 = vector.shape_cast %36 : vector<1x8x8xf32> to vector<8x8xf32>
    %38 = vector.shape_cast %35 : vector<8x8xf32> to vector<1x8x8xf32>
    tpu.vector_store %arg6[%c0_24, %c0_25, %c0_26], %38 {strides = array<i32>} : memref<1x8x32xf32, #tpu.memory_space<vmem>>, vector<1x8x8xf32>,
    %39 = vector.extract_strided_slice %1 {offsets = [0, 8], sizes = [8, 8], strides = [1, 1]} : vector<8x32xf32> to vector<8x8xf32>
    %40 = vector.extract_strided_slice %3 {offsets = [0, 8], sizes = [4, 8], strides = [1, 1]} : vector<4x32xf32> to vector<4x8xf32>
    %41 = vector.extract_strided_slice %5 {offsets = [0, 8], sizes = [4, 8], strides = [1, 1]} : vector<4x32xf32> to vector<4x8xf32>
    %cst_27 = arith.constant dense<0.000000e+00> : vector<8x4xf32>
    %42 = tpu.matmul %39, %40, %cst_27 {dimension_numbers = #tpu.dot_dimension_numbers<[1], [1], [0], [0], [0, 0, 1, 0], [], []>} : vector<8x8xf32>, vector<4x8xf32>, vector<8x4xf32> -> vector<8x4xf32>
    %cst_28 = arith.constant 0.353553385 : f32
    %43 = vector.broadcast %cst_28 : f32 to vector<8x4xf32>
    %44 = arith.mulf %42, %43 : vector<8x4xf32>
    %45 = vector.extract_strided_slice %7 {offsets = [1, 0, 0], sizes = [1, 8, 4], strides = [1, 1, 1]} : vector<4x8x4xf32> to vector<1x8x4xf32>
    %46 = vector.shape_cast %45 : vector<1x8x4xf32> to vector<8x4xf32>
    %47 = arith.mulf %44, %46 : vector<8x4xf32>
    %48 = vector.extract_strided_slice %9 {offsets = [1, 0, 0], sizes = [1, 8, 4], strides = [1, 1, 1]} : vector<4x8x4xf32> to vector<1x8x4xf32>
    %49 = vector.shape_cast %48 : vector<1x8x4xf32> to vector<8x4xf32>
    %50 = arith.addf %47, %49 : vector<8x4xf32>
    %c0_29 = arith.constant 0 : index
    %c1 = arith.constant 1 : index
    %c0_30 = arith.constant 0 : index
    %c0_31 = arith.constant 0 : index
    %51 = vector.load %arg7[%c0_29, %c1, %c0_30, %c0_31] : memref<1x4x8x4xf32, #tpu.memory_space<vmem>>, vector<1x1x8x4xf32>
    %52 = vector.shape_cast %51 : vector<1x1x8x4xf32> to vector<8x4xf32>
    %53 = vector.shape_cast %50 : vector<8x4xf32> to vector<1x1x8x4xf32>
    tpu.vector_store %arg7[%c0_29, %c1, %c0_30, %c0_31], %53 {strides = array<i32>} : memref<1x4x8x4xf32, #tpu.memory_space<vmem>>, vector<1x1x8x4xf32>,
    %cst_32 = arith.constant dense<0xFF800000> : vector<8xf32>
    %54 = vector.multi_reduction <maximumf>, %50, %cst_32 [1] : vector<8x4xf32> to vector<8xf32>
    %55 = vector.shape_cast %54 : vector<8xf32> to vector<8x1xf32>
    %56 = vector.broadcast %55 : vector<8x1xf32> to vector<8x4xf32>
    %57 = arith.subf %50, %56 : vector<8x4xf32>
    %58 = math.exp %57 : vector<8x4xf32>
    %cst_33 = arith.constant dense<0.000000e+00> : vector<8xf32>
    %59 = vector.multi_reduction <add>, %58, %cst_33 [1] : vector<8x4xf32> to vector<8xf32>
    %60 = vector.shape_cast %59 : vector<8xf32> to vector<8x1xf32>
    %61 = tpu.reciprocal %60 {approx = true} : vector<8x1xf32> -> vector<8x1xf32>
    %62 = vector.broadcast %61 : vector<8x1xf32> to vector<8x4xf32>
    %63 = arith.mulf %58, %62 : vector<8x4xf32>
    %cst_34 = arith.constant dense<0.000000e+00> : vector<8x8xf32>
    %64 = tpu.matmul %63, %41, %cst_34 {dimension_numbers = #tpu.dot_dimension_numbers<[1], [0], [0], [1], [0, 0, 1, 1], [], []>} : vector<8x4xf32>, vector<4x8xf32>, vector<8x8xf32> -> vector<8x8xf32>
    %c0_35 = arith.constant 0 : index
    %c0_36 = arith.constant 0 : index
    %c8 = arith.constant 8 : index
    %65 = vector.load %arg6[%c0_35, %c0_36, %c8] : memref<1x8x32xf32, #tpu.memory_space<vmem>>, vector<1x8x8xf32>
    %66 = vector.shape_cast %65 : vector<1x8x8xf32> to vector<8x8xf32>
    %67 = vector.shape_cast %64 : vector<8x8xf32> to vector<1x8x8xf32>
    tpu.vector_store %arg6[%c0_35, %c0_36, %c8], %67 {strides = array<i32>} : memref<1x8x32xf32, #tpu.memory_space<vmem>>, vector<1x8x8xf32>,
    %68 = vector.extract_strided_slice %1 {offsets = [0, 16], sizes = [8, 8], strides = [1, 1]} : vector<8x32xf32> to vector<8x8xf32>
    %69 = vector.extract_strided_slice %3 {offsets = [0, 16], sizes = [4, 8], strides = [1, 1]} : vector<4x32xf32> to vector<4x8xf32>
    %70 = vector.extract_strided_slice %5 {offsets = [0, 16], sizes = [4, 8], strides = [1, 1]} : vector<4x32xf32> to vector<4x8xf32>
    %cst_37 = arith.constant dense<0.000000e+00> : vector<8x4xf32>
    %71 = tpu.matmul %68, %69, %cst_37 {dimension_numbers = #tpu.dot_dimension_numbers<[1], [1], [0], [0], [0, 0, 1, 0], [], []>} : vector<8x8xf32>, vector<4x8xf32>, vector<8x4xf32> -> vector<8x4xf32>
    %cst_38 = arith.constant 0.353553385 : f32
    %72 = vector.broadcast %cst_38 : f32 to vector<8x4xf32>
    %73 = arith.mulf %71, %72 : vector<8x4xf32>
    %74 = vector.extract_strided_slice %7 {offsets = [2, 0, 0], sizes = [1, 8, 4], strides = [1, 1, 1]} : vector<4x8x4xf32> to vector<1x8x4xf32>
    %75 = vector.shape_cast %74 : vector<1x8x4xf32> to vector<8x4xf32>
    %76 = arith.mulf %73, %75 : vector<8x4xf32>
    %77 = vector.extract_strided_slice %9 {offsets = [2, 0, 0], sizes = [1, 8, 4], strides = [1, 1, 1]} : vector<4x8x4xf32> to vector<1x8x4xf32>
    %78 = vector.shape_cast %77 : vector<1x8x4xf32> to vector<8x4xf32>
    %79 = arith.addf %76, %78 : vector<8x4xf32>
    %c0_39 = arith.constant 0 : index
    %c2 = arith.constant 2 : index
    %c0_40 = arith.constant 0 : index
    %c0_41 = arith.constant 0 : index
    %80 = vector.load %arg7[%c0_39, %c2, %c0_40, %c0_41] : memref<1x4x8x4xf32, #tpu.memory_space<vmem>>, vector<1x1x8x4xf32>
    %81 = vector.shape_cast %80 : vector<1x1x8x4xf32> to vector<8x4xf32>
    %82 = vector.shape_cast %79 : vector<8x4xf32> to vector<1x1x8x4xf32>
    tpu.vector_store %arg7[%c0_39, %c2, %c0_40, %c0_41], %82 {strides = array<i32>} : memref<1x4x8x4xf32, #tpu.memory_space<vmem>>, vector<1x1x8x4xf32>,
    %cst_42 = arith.constant dense<0xFF800000> : vector<8xf32>
    %83 = vector.multi_reduction <maximumf>, %79, %cst_42 [1] : vector<8x4xf32> to vector<8xf32>
    %84 = vector.shape_cast %83 : vector<8xf32> to vector<8x1xf32>
    %85 = vector.broadcast %84 : vector<8x1xf32> to vector<8x4xf32>
    %86 = arith.subf %79, %85 : vector<8x4xf32>
    %87 = math.exp %86 : vector<8x4xf32>
    %cst_43 = arith.constant dense<0.000000e+00> : vector<8xf32>
    %88 = vector.multi_reduction <add>, %87, %cst_43 [1] : vector<8x4xf32> to vector<8xf32>
    %89 = vector.shape_cast %88 : vector<8xf32> to vector<8x1xf32>
    %90 = tpu.reciprocal %89 {approx = true} : vector<8x1xf32> -> vector<8x1xf32>
    %91 = vector.broadcast %90 : vector<8x1xf32> to vector<8x4xf32>
    %92 = arith.mulf %87, %91 : vector<8x4xf32>
    %cst_44 = arith.constant dense<0.000000e+00> : vector<8x8xf32>
    %93 = tpu.matmul %92, %70, %cst_44 {dimension_numbers = #tpu.dot_dimension_numbers<[1], [0], [0], [1], [0, 0, 1, 1], [], []>} : vector<8x4xf32>, vector<4x8xf32>, vector<8x8xf32> -> vector<8x8xf32>
    %c0_45 = arith.constant 0 : index
    %c0_46 = arith.constant 0 : index
    %c16 = arith.constant 16 : index
    %94 = vector.load %arg6[%c0_45, %c0_46, %c16] : memref<1x8x32xf32, #tpu.memory_space<vmem>>, vector<1x8x8xf32>
    %95 = vector.shape_cast %94 : vector<1x8x8xf32> to vector<8x8xf32>
    %96 = vector.shape_cast %93 : vector<8x8xf32> to vector<1x8x8xf32>
    tpu.vector_store %arg6[%c0_45, %c0_46, %c16], %96 {strides = array<i32>} : memref<1x8x32xf32, #tpu.memory_space<vmem>>, vector<1x8x8xf32>,
    %97 = vector.extract_strided_slice %1 {offsets = [0, 24], sizes = [8, 8], strides = [1, 1]} : vector<8x32xf32> to vector<8x8xf32>
    %98 = vector.extract_strided_slice %3 {offsets = [0, 24], sizes = [4, 8], strides = [1, 1]} : vector<4x32xf32> to vector<4x8xf32>
    %99 = vector.extract_strided_slice %5 {offsets = [0, 24], sizes = [4, 8], strides = [1, 1]} : vector<4x32xf32> to vector<4x8xf32>
    %cst_47 = arith.constant dense<0.000000e+00> : vector<8x4xf32>
    %100 = tpu.matmul %97, %98, %cst_47 {dimension_numbers = #tpu.dot_dimension_numbers<[1], [1], [0], [0], [0, 0, 1, 0], [], []>} : vector<8x8xf32>, vector<4x8xf32>, vector<8x4xf32> -> vector<8x4xf32>
    %cst_48 = arith.constant 0.353553385 : f32
    %101 = vector.broadcast %cst_48 : f32 to vector<8x4xf32>
    %102 = arith.mulf %100, %101 : vector<8x4xf32>
    %103 = vector.extract_strided_slice %7 {offsets = [3, 0, 0], sizes = [1, 8, 4], strides = [1, 1, 1]} : vector<4x8x4xf32> to vector<1x8x4xf32>
    %104 = vector.shape_cast %103 : vector<1x8x4xf32> to vector<8x4xf32>
    %105 = arith.mulf %102, %104 : vector<8x4xf32>
    %106 = vector.extract_strided_slice %9 {offsets = [3, 0, 0], sizes = [1, 8, 4], strides = [1, 1, 1]} : vector<4x8x4xf32> to vector<1x8x4xf32>
    %107 = vector.shape_cast %106 : vector<1x8x4xf32> to vector<8x4xf32>
    %108 = arith.addf %105, %107 : vector<8x4xf32>
    %c0_49 = arith.constant 0 : index
    %c3 = arith.constant 3 : index
    %c0_50 = arith.constant 0 : index
    %c0_51 = arith.constant 0 : index
    %109 = vector.load %arg7[%c0_49, %c3, %c0_50, %c0_51] : memref<1x4x8x4xf32, #tpu.memory_space<vmem>>, vector<1x1x8x4xf32>
    %110 = vector.shape_cast %109 : vector<1x1x8x4xf32> to vector<8x4xf32>
    %111 = vector.shape_cast %108 : vector<8x4xf32> to vector<1x1x8x4xf32>
    tpu.vector_store %arg7[%c0_49, %c3, %c0_50, %c0_51], %111 {strides = array<i32>} : memref<1x4x8x4xf32, #tpu.memory_space<vmem>>, vector<1x1x8x4xf32>,
    %cst_52 = arith.constant dense<0xFF800000> : vector<8xf32>
    %112 = vector.multi_reduction <maximumf>, %108, %cst_52 [1] : vector<8x4xf32> to vector<8xf32>
    %113 = vector.shape_cast %112 : vector<8xf32> to vector<8x1xf32>
    %114 = vector.broadcast %113 : vector<8x1xf32> to vector<8x4xf32>
    %115 = arith.subf %108, %114 : vector<8x4xf32>
    %116 = math.exp %115 : vector<8x4xf32>
    %cst_53 = arith.constant dense<0.000000e+00> : vector<8xf32>
    %117 = vector.multi_reduction <add>, %116, %cst_53 [1] : vector<8x4xf32> to vector<8xf32>
    %118 = vector.shape_cast %117 : vector<8xf32> to vector<8x1xf32>
    %119 = tpu.reciprocal %118 {approx = true} : vector<8x1xf32> -> vector<8x1xf32>
    %120 = vector.broadcast %119 : vector<8x1xf32> to vector<8x4xf32>
    %121 = arith.mulf %116, %120 : vector<8x4xf32>
    %cst_54 = arith.constant dense<0.000000e+00> : vector<8x8xf32>
    %122 = tpu.matmul %121, %99, %cst_54 {dimension_numbers = #tpu.dot_dimension_numbers<[1], [0], [0], [1], [0, 0, 1, 1], [], []>} : vector<8x4xf32>, vector<4x8xf32>, vector<8x8xf32> -> vector<8x8xf32>
    %c0_55 = arith.constant 0 : index
    %c0_56 = arith.constant 0 : index
    %c24 = arith.constant 24 : index
    %123 = vector.load %arg6[%c0_55, %c0_56, %c24] : memref<1x8x32xf32, #tpu.memory_space<vmem>>, vector<1x8x8xf32>
    %124 = vector.shape_cast %123 : vector<1x8x8xf32> to vector<8x8xf32>
    %125 = vector.shape_cast %122 : vector<8x8xf32> to vector<1x8x8xf32>
    tpu.vector_store %arg6[%c0_55, %c0_56, %c24], %125 {strides = array<i32>} : memref<1x8x32xf32, #tpu.memory_space<vmem>>, vector<1x8x8xf32>,
    return
  }
  func.func @transform_0(%arg0: i32) -> (i32, i32, i32) {
    %c0_i32 = arith.constant 0 : i32
    %c0_i32_0 = arith.constant 0 : i32
    %c0_i32_1 = arith.constant 0 : i32
    return %arg0, %c0_i32, %c0_i32_0 : i32, i32, i32
  }
  func.func @transform_1(%arg0: i32) -> (i32, i32, i32) {
    %c0_i32 = arith.constant 0 : i32
    %c0_i32_0 = arith.constant 0 : i32
    %c0_i32_1 = arith.constant 0 : i32
    return %arg0, %c0_i32, %c0_i32_0 : i32, i32, i32
  }
  func.func @transform_2(%arg0: i32) -> (i32, i32, i32) {
    %c0_i32 = arith.constant 0 : i32
    %c0_i32_0 = arith.constant 0 : i32
    %c0_i32_1 = arith.constant 0 : i32
    return %arg0, %c0_i32, %c0_i32_0 : i32, i32, i32
  }
  func.func @transform_3(%arg0: i32) -> (i32, i32, i32, i32) {
    %c0_i32 = arith.constant 0 : i32
    %c0_i32_0 = arith.constant 0 : i32
    %c0_i32_1 = arith.constant 0 : i32
    %c0_i32_2 = arith.constant 0 : i32
    return %arg0, %c0_i32, %c0_i32_0, %c0_i32_1 : i32, i32, i32, i32
  }
  func.func @transform_4(%arg0: i32) -> (i32, i32, i32, i32) {
    %c0_i32 = arith.constant 0 : i32
    %c0_i32_0 = arith.constant 0 : i32
    %c0_i32_1 = arith.constant 0 : i32
    %c0_i32_2 = arith.constant 0 : i32
    return %arg0, %c0_i32, %c0_i32_0, %c0_i32_1 : i32, i32, i32, i32
  }
  func.func @transform_5(%arg0: i32) -> (i32, i32, i32) {
    %c0_i32 = arith.constant 0 : i32
    %c0_i32_0 = arith.constant 0 : i32
    %c0_i32_1 = arith.constant 0 : i32
    return %arg0, %c0_i32, %c0_i32_0 : i32, i32, i32
  }
  func.func @transform_6(%arg0: i32) -> (i32, i32, i32, i32) {
    %c0_i32 = arith.constant 0 : i32
    %c0_i32_0 = arith.constant 0 : i32
    %c0_i32_1 = arith.constant 0 : i32
    %c0_i32_2 = arith.constant 0 : i32
    return %arg0, %c0_i32, %c0_i32_0, %c0_i32_1 : i32, i32, i32, i32
  }
}

module attributes {stable_mosaic.version = 11 : i64} {
  func.func @_linear_kernel(%arg0: i32, %arg1: i32, %arg2: memref<8x32xf32, #tpu.memory_space<vmem>>, %arg3: memref<32x128xbf16, #tpu.memory_space<vmem>>, %arg4: memref<1x128xf32, #tpu.memory_space<vmem>>, %arg5: memref<8x128xf32, #tpu.memory_space<vmem>>) attributes {dimension_semantics = [#tpu.dimension_semantics<parallel>, #tpu.dimension_semantics<parallel>], iteration_bounds = array<i64: 2, 1>, scalar_prefetch = 0 : i64, scratch_operands = 0 : i64, tpu.core_type = #tpu.core_type<tc>, window_params = [{transform_indices = @transform_0, window_bounds = array<i64: 8, 32>}, {transform_indices = @transform_1, window_bounds = array<i64: 32, 128>}, {transform_indices = @transform_2, window_bounds = array<i64: 1, 128>}, {transform_indices = @transform_3, window_bounds = array<i64: 8, 128>}]} {
    %c0 = arith.constant 0 : index
    %c0_0 = arith.constant 0 : index
    %0 = vector.load %arg2[%c0, %c0_0] : memref<8x32xf32, #tpu.memory_space<vmem>>, vector<8x32xf32>
    %1 = arith.truncf %0 : vector<8x32xf32> to vector<8x32xbf16>
    %c0_1 = arith.constant 0 : index
    %c0_2 = arith.constant 0 : index
    %2 = vector.load %arg3[%c0_1, %c0_2] : memref<32x128xbf16, #tpu.memory_space<vmem>>, vector<32x128xbf16>
    %cst = arith.constant dense<0.000000e+00> : vector<8x128xf32>
    %3 = tpu.matmul %1, %2, %cst {dimension_numbers = #tpu.dot_dimension_numbers<[1], [0], [0], [1], [0, 0, 1, 1], [], []>} : vector<8x32xbf16>, vector<32x128xbf16>, vector<8x128xf32> -> vector<8x128xf32>
    %c0_3 = arith.constant 0 : index
    %c0_4 = arith.constant 0 : index
    %4 = vector.load %arg4[%c0_3, %c0_4] : memref<1x128xf32, #tpu.memory_space<vmem>>, vector<1x128xf32>
    %5 = vector.broadcast %4 : vector<1x128xf32> to vector<8x128xf32>
    %6 = arith.addf %3, %5 : vector<8x128xf32>
    %cst_5 = arith.constant 5.000000e-01 : f32
    %7 = vector.broadcast %cst_5 : f32 to vector<8x128xf32>
    %8 = arith.mulf %7, %6 : vector<8x128xf32>
    %cst_6 = arith.constant 4.471500e-02 : f32
    %9 = vector.broadcast %cst_6 : f32 to vector<8x128xf32>
    %10 = arith.mulf %9, %6 : vector<8x128xf32>
    %11 = arith.mulf %10, %6 : vector<8x128xf32>
    %12 = arith.mulf %11, %6 : vector<8x128xf32>
    %13 = arith.addf %6, %12 : vector<8x128xf32>
    %cst_7 = arith.constant 0.797884583 : f32
    %14 = vector.broadcast %cst_7 : f32 to vector<8x128xf32>
    %15 = arith.mulf %14, %13 : vector<8x128xf32>
    %16 = math.tanh %15 : vector<8x128xf32>
    %cst_8 = arith.constant 1.000000e+00 : f32
    %17 = vector.broadcast %cst_8 : f32 to vector<8x128xf32>
    %18 = arith.addf %17, %16 : vector<8x128xf32>
    %19 = arith.mulf %8, %18 : vector<8x128xf32>
    %c0_9 = arith.constant 0 : index
    %c0_10 = arith.constant 0 : index
    %20 = vector.load %arg5[%c0_9, %c0_10] : memref<8x128xf32, #tpu.memory_space<vmem>>, vector<8x128xf32>
    tpu.vector_store %arg5[%c0_9, %c0_10], %19 {strides = array<i32>} : memref<8x128xf32, #tpu.memory_space<vmem>>, vector<8x128xf32>,
    return
  }
  func.func @transform_0(%arg0: i32, %arg1: i32) -> (i32, i32) {
    %c0_i32 = arith.constant 0 : i32
    %c0_i32_0 = arith.constant 0 : i32
    return %arg0, %c0_i32 : i32, i32
  }
  func.func @transform_1(%arg0: i32, %arg1: i32) -> (i32, i32) {
    %c0_i32 = arith.constant 0 : i32
    %c0_i32_0 = arith.constant 0 : i32
    return %c0_i32, %arg1 : i32, i32
  }
  func.func @transform_2(%arg0: i32, %arg1: i32) -> (i32, i32) {
    %c0_i32 = arith.constant 0 : i32
    %c0_i32_0 = arith.constant 0 : i32
    return %c0_i32, %arg1 : i32, i32
  }
  func.func @transform_3(%arg0: i32, %arg1: i32) -> (i32, i32) {
    %c0_i32 = arith.constant 0 : i32
    return %arg0, %arg1 : i32, i32
  }
}

module attributes {stable_mosaic.version = 11 : i64} {
  func.func @_linear_kernel(%arg0: i32, %arg1: i32, %arg2: memref<8x128xf32, #tpu.memory_space<vmem>>, %arg3: memref<128x32xbf16, #tpu.memory_space<vmem>>, %arg4: memref<1x32xf32, #tpu.memory_space<vmem>>, %arg5: memref<8x32xf32, #tpu.memory_space<vmem>>) attributes {dimension_semantics = [#tpu.dimension_semantics<parallel>, #tpu.dimension_semantics<parallel>], iteration_bounds = array<i64: 2, 1>, scalar_prefetch = 0 : i64, scratch_operands = 0 : i64, tpu.core_type = #tpu.core_type<tc>, window_params = [{transform_indices = @transform_0, window_bounds = array<i64: 8, 128>}, {transform_indices = @transform_1, window_bounds = array<i64: 128, 32>}, {transform_indices = @transform_2, window_bounds = array<i64: 1, 32>}, {transform_indices = @transform_3, window_bounds = array<i64: 8, 32>}]} {
    %c0 = arith.constant 0 : index
    %c0_0 = arith.constant 0 : index
    %0 = vector.load %arg2[%c0, %c0_0] : memref<8x128xf32, #tpu.memory_space<vmem>>, vector<8x128xf32>
    %1 = arith.truncf %0 : vector<8x128xf32> to vector<8x128xbf16>
    %c0_1 = arith.constant 0 : index
    %c0_2 = arith.constant 0 : index
    %2 = vector.load %arg3[%c0_1, %c0_2] : memref<128x32xbf16, #tpu.memory_space<vmem>>, vector<128x32xbf16>
    %cst = arith.constant dense<0.000000e+00> : vector<8x32xf32>
    %3 = tpu.matmul %1, %2, %cst {dimension_numbers = #tpu.dot_dimension_numbers<[1], [0], [0], [1], [0, 0, 1, 1], [], []>} : vector<8x128xbf16>, vector<128x32xbf16>, vector<8x32xf32> -> vector<8x32xf32>
    %c0_3 = arith.constant 0 : index
    %c0_4 = arith.constant 0 : index
    %4 = vector.load %arg4[%c0_3, %c0_4] : memref<1x32xf32, #tpu.memory_space<vmem>>, vector<1x32xf32>
    %5 = vector.broadcast %4 : vector<1x32xf32> to vector<8x32xf32>
    %6 = arith.addf %3, %5 : vector<8x32xf32>
    %c0_5 = arith.constant 0 : index
    %c0_6 = arith.constant 0 : index
    %7 = vector.load %arg5[%c0_5, %c0_6] : memref<8x32xf32, #tpu.memory_space<vmem>>, vector<8x32xf32>
    tpu.vector_store %arg5[%c0_5, %c0_6], %6 {strides = array<i32>} : memref<8x32xf32, #tpu.memory_space<vmem>>, vector<8x32xf32>,
    return
  }
  func.func @transform_0(%arg0: i32, %arg1: i32) -> (i32, i32) {
    %c0_i32 = arith.constant 0 : i32
    %c0_i32_0 = arith.constant 0 : i32
    return %arg0, %c0_i32 : i32, i32
  }
  func.func @transform_1(%arg0: i32, %arg1: i32) -> (i32, i32) {
    %c0_i32 = arith.constant 0 : i32
    %c0_i32_0 = arith.constant 0 : i32
    return %c0_i32, %arg1 : i32, i32
  }
  func.func @transform_2(%arg0: i32, %arg1: i32) -> (i32, i32) {
    %c0_i32 = arith.constant 0 : i32
    %c0_i32_0 = arith.constant 0 : i32
    return %c0_i32, %arg1 : i32, i32
  }
  func.func @transform_3(%arg0: i32, %arg1: i32) -> (i32, i32) {
    %c0_i32 = arith.constant 0 : i32
    return %arg0, %arg1 : i32, i32
  }
}

</mosaic_0001>

<bundles_post_ra>
// kernel: _lambda_.20
= control target key start
LH: loop header
LB: loop body
LE: loop exit
PB: predicated region body
PF: predicated region fallthrough
CT: control target
= control target key end

     0   :  { %s488_s12 = smov 0   ;;  %s490_s13 = smov 0   ;;  %s530_s0 = inlined_call_operand.vmem [shape: f32[16,32], index: 0, kind: input, shape index: {}]   ;;  %s531_s1 = inlined_call_operand.vmem [shape: bf16[32,4], index: 1, kind: input, shape index: {}]   ;;  %s532_s2 = inlined_call_operand.vmem [shape: f32[1,4], index: 2, kind: input, shape index: {}]   ;;  %s533_s3 = inlined_call_operand.vmem [shape: f32[16,4], index: 3, kind: output, shape index: {}]  }
   0x1   :  { %s492_s14 = smov 0  }
   0x2 LB: > { %s25_s15 = sadd.s32 1, %s460_s13  ;;  %p394_p0 = scmp.ge.s32.totalorder %s464_s14, 1  ;;  %s464_s14 = sphi %s492_s14, %s13_s14   ;;  %s460_s13 = sphi %s490_s13, %s535_s13   ;;  %s456_s12 = sphi %s488_s12, %s534_s12  }
   0x3   : > { %p27_p1 = scmp.ge.s32.totalorder %s25_s15, 2  ;;  %p167_p2 = scmp.lt.s32.totalorder %s464_s14, 3 }
   0x5   : > { %s537_s15 = smov (%p27_p1, %s25_s15), 0  ;;  %p168_p3 = pnand %p394_p0, %p167_p2 }
   0x6   : > { %v440_v0 = vld [vmem:[%s531_s1] sm:$0xff] (!%p168_p3)   ;;  %v466_v1 = vmov (!%p168_p3), 0.0   ;;  %v441_v2 = vld [vmem:[%s531_s1 + $0x8] sm:$0xff] (!%p168_p3)   ;;  %vm467_vm0 = vmmov (!%p168_p3), 0   ;;  %p199_p4 = scmp.lt.s32.totalorder (!%p168_p3), %s456_s12, 1  ;;  %vm243_vm1 = vcmask (!%p168_p3), 261120  }
   0x7   : > { %171 = sbr.rel (%p168_p3) target bundleno = 235 (0xeb), region = 32  ;;  %406 = vmatprep.subr.bf16.mxu0 (!%p168_p3), %v466_v1  ;;  %410 = vmatprep.mubr.msk.bf16.mxu0 (!%p168_p3), %vm467_vm0, %v466_v1  ;;  %v397_v5 = vld [vmem:[%s532_s2] ss:$0 sm:$0xff] (!%p168_p3)  ;;  %vm287_vm2 = vcmask (!%p168_p3), 31744  }
   0x8   : > { %407 = vmatpush3.bf16.msra.mxu0 (!%p168_p3), %v440_v0 }
   0x9   : > { %408 = vmatprep.subr.bf16.mxu0 (!%p168_p3), %v466_v1 }
   0xc   : > { %409 = vmatpush3.bf16.msra.mxu0 (!%p168_p3), %v441_v2 }
   0xe   : > { %s539_s12 = smov (!%p199_p4, %s456_s12), 1 }
   0xf   : > { %s395_s20 = sshll.u32 %s539_s12, 3 }
  0x10   : > { %s202_s23 = scalar_lea.vmem %s530_s0, %s395_s20  ;;  %s216_s28 = scalar_lea.vmem %s533_s3, %s395_s20 }
  0x11   : > { %v218_v3 = vld [vmem:[%s202_s23] sm:$0xff] }
  0x12   : > { %v219_v4 = vpack.c.bf16 %v218_v3, %v218_v3 }
  0x14   : > { %411 = vmatmul.mubr.msk.bf16.vlgmr.msra.gmra.mrb[0].mxu0 %vm243_vm1, %v219_v4 }
  0xe7   : > { %v281_v6 = vpop.f32.mrb[0].mxu0 }
  0xe8   : > { %v282_v7 = vadd.f32 %v397_v5, %v281_v6  ;;  %v412_v8 = vpop.f32.mrb[1].mxu0 }
  0xe9   : > { %v284_v9 = vpop.f32.mrb[2].mxu0 }
  0xea   : > { %288 = vst.msk [vmem:[%s216_s28] sm:$0xff] %vm287_vm2, %v282_v7  ;;  %v413_v10 = vpop.f32.mrb[3].mxu0 }
  0xeb PF: > { %s13_s14 = sadd.s32 1, %s464_s14   ;;  %s534_s12 = smov %s460_s13 }
  0xec   : > { %p10_p5 = scmp.ge.s32.totalorder %s13_s14, 4   ;;  %s535_s13 = smov %s537_s15 }
  0xee   :  { %12 = sbr.rel (!%p10_p5) target bundleno = 2 (0x2), region = 68 }

// kernel: _lambda_.22
= control target key start
LH: loop header
LB: loop body
LE: loop exit
PB: predicated region body
PF: predicated region fallthrough
CT: control target
= control target key end

     0   :  { %v108_v0 = vmov 0.0   ;;  %vm109_vm0 = vmmov 0   ;;  %vm40_vm1 = vcmask 261120   ;;  %s145_s1 = inlined_call_operand.vmem [shape: bf16[32,32], index: 1, kind: input, shape index: {}]   ;;  %s146_s0 = inlined_call_operand.vmem [shape: f32[8,32], index: 0, kind: input, shape index: {}]   ;;  %s147_s2 = inlined_call_operand.vmem [shape: f32[1,32], index: 2, kind: input, shape index: {}]   ;;  %s148_s3 = inlined_call_operand.vmem [shape: f32[8,32], index: 3, kind: output, shape index: {}]  }
   0x1   :  { %96 = vmatprep.subr.bf16.mxu0 %v108_v0  ;;  %v106_v1 = vld [vmem:[%s145_s1] sm:$0xff]   ;;  %100 = vmatprep.mubr.msk.bf16.mxu0 %vm109_vm0, %v108_v0  ;;  %v107_v2 = vld [vmem:[%s145_s1 + $0x8] sm:$0xff]  }
   0x2   :  { %97 = vmatpush3.bf16.msra.mxu0 %v106_v1  ;;  %v15_v3 = vld [vmem:[%s146_s0] sm:$0xff] }
   0x3   :  { %98 = vmatprep.subr.bf16.mxu0 %v108_v0  ;;  %v16_v4 = vpack.c.bf16 %v15_v3, %v15_v3  ;;  %v89_v5 = vld [vmem:[%s147_s2] ss:$0 sm:$0xff] }
   0x6   :  { %99 = vmatpush3.bf16.msra.mxu0 %v107_v2 }
   0x9   :  { %101 = vmatmul.mubr.msk.bf16.vlgmr.msra.gmra.mrb[0].mxu0 %vm40_vm1, %v16_v4 }
  0xdc   :  { %v78_v6 = vpop.f32.mrb[0].mxu0 }
  0xdd   :  { %v79_v7 = vadd.f32 %v89_v5, %v78_v6  ;;  %v102_v8 = vpop.f32.mrb[1].mxu0 }
  0xde   :  { %v81_v9 = vpop.f32.mrb[2].mxu0 }
  0xdf   :  { %84 = vst.msk [vmem:[%s148_s3] sm:$0xff] %vm40_vm1, %v79_v7  ;;  %v103_v10 = vpop.f32.mrb[3].mxu0 }

// kernel: _lambda_.21
= control target key start
LH: loop header
LB: loop body
LE: loop exit
PB: predicated region body
PF: predicated region fallthrough
CT: control target
= control target key end

     0   :  { %s487_s12 = smov 0   ;;  %s489_s13 = smov 0   ;;  %s529_s0 = inlined_call_operand.vmem [shape: f32[16,32], index: 0, kind: input, shape index: {}]   ;;  %s530_s1 = inlined_call_operand.vmem [shape: bf16[32,32], index: 1, kind: input, shape index: {}]   ;;  %s531_s2 = inlined_call_operand.vmem [shape: f32[1,32], index: 2, kind: input, shape index: {}]   ;;  %s532_s3 = inlined_call_operand.vmem [shape: f32[16,32], index: 3, kind: output, shape index: {}]  }
   0x1   :  { %s491_s14 = smov 0  }
   0x2 LB: > { %s25_s15 = sadd.s32 1, %s459_s13  ;;  %p393_p0 = scmp.ge.s32.totalorder %s463_s14, 1  ;;  %s463_s14 = sphi %s491_s14, %s13_s14   ;;  %s459_s13 = sphi %s489_s13, %s534_s13   ;;  %s455_s12 = sphi %s487_s12, %s533_s12  }
   0x3   : > { %p27_p1 = scmp.ge.s32.totalorder %s25_s15, 2  ;;  %p167_p2 = scmp.lt.s32.totalorder %s463_s14, 3 }
   0x5   : > { %s536_s15 = smov (%p27_p1, %s25_s15), 0  ;;  %p168_p3 = pnand %p393_p0, %p167_p2 }
   0x6   : > { %v439_v0 = vld [vmem:[%s530_s1] sm:$0xff] (!%p168_p3)   ;;  %v465_v1 = vmov (!%p168_p3), 0.0   ;;  %v440_v2 = vld [vmem:[%s530_s1 + $0x8] sm:$0xff] (!%p168_p3)   ;;  %vm466_vm0 = vmmov (!%p168_p3), 0   ;;  %p199_p4 = scmp.lt.s32.totalorder (!%p168_p3), %s455_s12, 1  ;;  %vm243_vm1 = vcmask (!%p168_p3), 261120  }
   0x7   : > { %171 = sbr.rel (%p168_p3) target bundleno = 235 (0xeb), region = 32  ;;  %405 = vmatprep.subr.bf16.mxu0 (!%p168_p3), %v465_v1  ;;  %409 = vmatprep.mubr.msk.bf16.mxu0 (!%p168_p3), %vm466_vm0, %v465_v1  ;;  %v396_v5 = vld [vmem:[%s531_s2] ss:$0 sm:$0xff] (!%p168_p3) }
   0x8   : > { %406 = vmatpush3.bf16.msra.mxu0 (!%p168_p3), %v439_v0 }
   0x9   : > { %407 = vmatprep.subr.bf16.mxu0 (!%p168_p3), %v465_v1 }
   0xc   : > { %408 = vmatpush3.bf16.msra.mxu0 (!%p168_p3), %v440_v2 }
   0xe   : > { %s538_s12 = smov (!%p199_p4, %s455_s12), 1 }
   0xf   : > { %s394_s20 = sshll.u32 %s538_s12, 3 }
  0x10   : > { %s202_s23 = scalar_lea.vmem %s529_s0, %s394_s20  ;;  %s216_s28 = scalar_lea.vmem %s532_s3, %s394_s20 }
  0x11   : > { %v218_v3 = vld [vmem:[%s202_s23] sm:$0xff] }
  0x12   : > { %v219_v4 = vpack.c.bf16 %v218_v3, %v218_v3 }
  0x14   : > { %410 = vmatmul.mubr.msk.bf16.vlgmr.msra.gmra.mrb[0].mxu0 %vm243_vm1, %v219_v4 }
  0xe7   : > { %v281_v6 = vpop.f32.mrb[0].mxu0 }
  0xe8   : > { %v282_v7 = vadd.f32 %v396_v5, %v281_v6  ;;  %v411_v8 = vpop.f32.mrb[1].mxu0 }
  0xe9   : > { %v284_v9 = vpop.f32.mrb[2].mxu0 }
  0xea   : > { %287 = vst.msk [vmem:[%s216_s28] sm:$0xff] %vm243_vm1, %v282_v7  ;;  %v412_v10 = vpop.f32.mrb[3].mxu0 }
  0xeb PF: > { %s13_s14 = sadd.s32 1, %s463_s14   ;;  %s533_s12 = smov %s459_s13 }
  0xec   : > { %p10_p5 = scmp.ge.s32.totalorder %s13_s14, 4   ;;  %s534_s13 = smov %s536_s15 }
  0xee   :  { %12 = sbr.rel (!%p10_p5) target bundleno = 2 (0x2), region = 68 }

// kernel: _lambda_.26
= control target key start
LH: loop header
LB: loop body
LE: loop exit
PB: predicated region body
PF: predicated region fallthrough
CT: control target
= control target key end

     0   :  { %s364_s15 = smov 0   ;;  %s393_s0 = inlined_call_operand.vmem [shape: f32[16,32], index: 0, kind: input, shape index: {}]   ;;  %s394_s1 = inlined_call_operand.vmem [shape: f32[16,32], index: 1, kind: input, shape index: {}]   ;;  %s395_s2 = inlined_call_operand.vmem [shape: f32[1,32], index: 2, kind: input, shape index: {}]   ;;  %s396_s3 = inlined_call_operand.vmem [shape: f32[1,32], index: 3, kind: input, shape index: {}]   ;;  %s397_s4 = inlined_call_operand.vmem [shape: f32[16,32], index: 4, kind: output, shape index: {}]  }
   0x1 LB: > { %s309_s16 = sadd.s32 4294967295, %s337_s15   ;;  %p313_p0 = scmp.ge.s32.totalorder %s337_s15, 1  ;;  %s337_s15 = sphi %s364_s15, %s14_s15  }
   0x2   : > { %p170_p1 = scmp.lt.s32.totalorder %s337_s15, 3 }
   0x4   : > { %p171_p2 = pnand %p313_p0, %p170_p1 }
   0x5   : > { %p198_p3 = scmp.lt.s32.totalorder (!%p171_p2), %s309_s16, 1  ;;  %vm213_vm0 = vcmask (!%p171_p2), 261120   ;;  %v317_v13 = vld [vmem:[%s395_s2] ss:$0 sm:$0xff] (!%p171_p2) }
   0x6   : > { %174 = sbr.rel (%p171_p2) target bundleno = 334 (0x14e), region = 36  ;;  %v318_v15 = vld [vmem:[%s396_s3] ss:$0 sm:$0xff] (!%p171_p2) }
   0xd   : > { %s399_s16 = smov (!%p198_p3, %s309_s16), 1 }
   0xe   : > { %s314_s17 = sshll.u32 %s399_s16, 3 }
   0xf   : > { %s201_s20 = scalar_lea.vmem %s393_s0, %s314_s17  ;;  %s205_s23 = scalar_lea.vmem %s394_s1, %s314_s17 }
  0x10   : > { %v210_v0 = vld [vmem:[%s201_s20] sm:$0xff]  ;;  %s209_s30 = scalar_lea.vmem %s397_s4, %s314_s17 }
  0x11   : > { %v211_v1 = vld [vmem:[%s205_s23] sm:$0xff] }
  0x12   : > { %v212_v2 = vadd.f32 %v211_v1, %v210_v0 }
  0x14   : > { %v214_v3 = vsel %vm213_vm0, %v212_v2, 0.0 }
  0x15   : > { %215 = vadd.xlane.f32.xlu0 %v214_v3 }
  0xa2   : > { %v216_v4 = vpop.xlane.xlu0 %215 }
  0xa3   : > { %v217_v5 = vmul.f32 0.03125, %v216_v4 }
  0xa5   : > { %v218_v6 = vsub.f32 %v212_v2, %v217_v5 }
  0xa7   : > { %v219_v7 = vmul.f32 %v218_v6, %v218_v6 }
  0xa9   : > { %v220_v8 = vsel %vm213_vm0, %v219_v7, 0.0 }
  0xaa   : > { %221 = vadd.xlane.f32.xlu0 %v220_v8 }
 0x137   : > { %v222_v9 = vpop.xlane.xlu0 %221 }
 0x138   : > { %v223_v10 = vmul.f32 0.03125, %v222_v9 }
 0x13a   : > { %v224_v11 = vadd.f32 1e-05, %v223_v10 }
 0x13c   : > { %329 = vrsqrt.f32 %v224_v11 }
 0x146   : > { %v330_v12 = vpop.eup %329 }
 0x147   : > { %v226_v14 = vmul.f32 %v330_v12, %v218_v6 }
 0x149   : > { %v234_v16 = vmul.f32 %v317_v13, %v226_v14 }
 0x14b   : > { %v242_v17 = vadd.f32 %v318_v15, %v234_v16 }
 0x14d   : > { %243 = vst.msk [vmem:[%s209_s30] sm:$0xff] %vm213_vm0, %v242_v17 }
 0x14e PF: > { %s14_s15 = sadd.s32 1, %s337_s15  }
 0x14f   : > { %p11_p4 = scmp.ge.s32.totalorder %s14_s15, 4  }
 0x151   :  { %13 = sbr.rel (!%p11_p4) target bundleno = 1 (0x1), region = 69 }

// kernel: _lambda_.24
= control target key start
LH: loop header
LB: loop body
LE: loop exit
PB: predicated region body
PF: predicated region fallthrough
CT: control target
= control target key end

     0   :  { %s1359_s21 = smov 0   ;;  %s1496_s0 = inlined_call_operand.vmem [shape: f32[2,8,32], index: 0, kind: input, shape index: {}]   ;;  %s1497_s1 = inlined_call_operand.vmem [shape: f32[2,4,32], index: 1, kind: input, shape index: {}]   ;;  %s1498_s2 = inlined_call_operand.vmem [shape: f32[2,4,32], index: 2, kind: input, shape index: {}]   ;;  %s1499_s3 = inlined_call_operand.vmem [shape: f32[2,4,8,4], index: 3, kind: input, shape index: {}]   ;;  %s1500_s4 = inlined_call_operand.vmem [shape: f32[2,4,8,4], index: 4, kind: input, shape index: {}]   ;;  %s1501_s5 = inlined_call_operand.vmem [shape: f32[2,8,32], index: 5, kind: output, shape index: {0}]   ;;  %s1502_s6 = inlined_call_operand.vmem [shape: f32[2,4,8,4], index: 6, kind: output, shape index: {1}]  }
   0x1 LB: > { %s1181_s22 = sadd.s32 4294967295, %s1314_s21   ;;  %p1185_p0 = scmp.ge.s32.totalorder %s1314_s21, 1  ;;  %s1314_s21 = sphi %s1359_s21, %s17_s21  }
   0x2   : > { %p252_p1 = scmp.lt.s32.totalorder %s1314_s21, 3 }
   0x4   : > { %p253_p2 = pnand %p1185_p0, %p252_p1 }
   0x5   : > { %p303_p3 = scmp.lt.s32.totalorder (!%p253_p2), %s1181_s22, 1  ;;  %v1316_v0 = vmov (!%p253_p2), 0.0   ;;  %vm1317_vm0 = vmmov (!%p253_p2), 0   ;;  %vm345_vm1 = vcmask (!%p253_p2), 64512   ;;  %vm425_vm2 = vcmask (!%p253_p2), 31744   ;;  %s1318_s17 = smov (!%p253_p2), 120  }
   0x6   : > { %256 = sbr.rel (%p253_p2) target bundleno = 1469 (0x5bd), region = 40  ;;  %1236 = vmatprep.subr.mxu0 (!%p253_p2), %v1316_v0  ;;  %1238 = vmatprep.mubr.msk.f32.mxu0 (!%p253_p2), %vm1317_vm0, %v1316_v0  ;;  %s1319_s18 = smov (!%p253_p2), 112   ;;  %vm441_vm3 = vcmask (!%p253_p2), 1043456   ;;  %vm691_vm4 = vcmask (!%p253_p2), 130112   ;;  %vm868_vm5 = vcmask (!%p253_p2), 195712   ;;  %vm1045_vm6 = vcmask (!%p253_p2), 261312  }
   0x7   : > { %1241 = vmatprep.subr.mxu1 (!%p253_p2), %v1316_v0  ;;  %1243 = vmatprep.mubr.msk.f32.mxu1 (!%p253_p2), %vm1317_vm0, %v1316_v0  ;;  %s1320_s19 = smov (!%p253_p2), 104   ;;  %s1323_s29 = smov (!%p253_p2), 24  }
   0xd   : > { %s1504_s22 = smov (!%p303_p3, %s1181_s22), 1 }
   0xe   : > { %s1187_s23 = sshll.u32 %s1504_s22, 2  ;;  %s1186_s24 = sshll.u32 %s1504_s22, 3 }
   0xf   : > { %s310_s27 = scalar_lea.vmem %s1497_s1, %s1187_s23  ;;  %s306_s30 = scalar_lea.vmem %s1496_s0, %s1186_s24 }
  0x10   : > { %v335_v1 = vld [vmem:[%s310_s27] sm:$0xf]  ;;  %s1217_s7 = sshll.u32 %s1504_s22, 5  ;;  %s314_s26 = scalar_lea.vmem %s1498_s2, %s1187_s23 }
  0x11   : > { %1237 = vmatpush3.xpose.msk.msra.mxu0 %vm345_vm1, %v335_v1  ;;  %v334_v2 = vld [vmem:[%s306_s30] sm:$0xff]  ;;  %s1396_s10 = scalar_lea.vmem %s1499_s3, %s1217_s7  ;;  %s1401_s13 = scalar_lea.vmem %s1500_s4, %s1217_s7  ;;  %518 = vrot.lane.b32.xlu1 %v335_v1, %s1318_s17 }
  0x12   : > { %1251 = vmatprep.subr.mxu0 %v1316_v0  ;;  %v337_v3 = vld [vmem:[%s1396_s10] sm:$0xff]  ;;  %s1408_s16 = scalar_lea.vmem %s1502_s6, %s1217_s7  ;;  %s1450_s28 = scalar_lea.vmem %s1501_s5, %s1186_s24  ;;  %v338_v28 = vld [vmem:[%s1396_s10 + $0x8] sm:$0xff]  ;;  %v339_v34 = vld [vmem:[%s1396_s10 + $0x10] sm:$0xff] }
  0x13   : > { %v341_v7 = vld [vmem:[%s1401_s13] sm:$0xff]  ;;  %v342_v32 = vld [vmem:[%s1401_s13 + $0x8] sm:$0xff]  ;;  %v343_v39 = vld [vmem:[%s1401_s13 + $0x10] sm:$0xff]  ;;  %s1321_s22 = smov 8   ;;  %s1322_s24 = smov 16  }
  0x14   : > { %1239 = vmatmul.mubr.msk.f32.vlgmr.msra.gmra.mrb[0].mxu0 %vm345_vm1, %v334_v2  ;;  %v1424_v16 = vld [vmem:[%s314_s26] sm:$0xf]  ;;  %v340_v42 = vld [vmem:[%s1396_s10 + $0x18] sm:$0xff] }
  0x15   : > { %1253 = vmatprep.mubr.msk.f32.mxu0 %vm1317_vm0, %v1316_v0  ;;  %516 = vrot.lane.b32.xlu1 %v334_v2, %s1318_s17  ;;  %v344_v47 = vld [vmem:[%s1401_s13 + $0x18] sm:$0xff] }
  0x16   : > { %1242 = vmatpush3.msk.msra.mxu1 %vm441_vm3, %v1424_v16 }
  0x17   : > { %1246 = vmatprep.subr.mxu1 %v1316_v0 }
  0x19   : > { %693 = vrot.lane.b32.xlu1 %v334_v2, %s1319_s18 }
  0x1d   : > { %872 = vrot.lane.b32.xlu1 %v335_v1, %s1320_s19 }
  0x21   : > { %870 = vrot.lane.b32.xlu1 %v334_v2, %s1320_s19 }
  0x83   : > { %v519_v17 = vpop.permute.xlu1 %518 }
  0x87   : > { %v517_v19 = vpop.permute.xlu1 %516 }
  0x8b   : > { %v694_v21 = vpop.permute.xlu1 %693 }
  0x8f   : > { %v873_v24 = vpop.permute.xlu1 %872 }
  0x93   : > { %v871_v25 = vpop.permute.xlu1 %870 }
  0xe7   : > { %v418_v4 = vpop.f32.mrb[0].mxu0 }
  0xe8   : > { %v422_v5 = vmul.f32 0.35355338, %v418_v4  ;;  %v1240_v6 = vpop.f32.mrb[1].mxu0 }
  0xea   : > { %v423_v8 = vmul.f32 %v422_v5, %v337_v3 }
  0xec   : > { %v424_v9 = vadd.f32 %v423_v8, %v341_v7 }
  0xee   : > { %v427_v10 = vsel %vm425_vm2, %v424_v9, -inf  ;;  %426 = vst.msk [vmem:[%s1408_s16] sm:$0xff] %vm425_vm2, %v424_v9 }
  0xef   : > { %428 = vmax.xlane.f32.xlu0 %v427_v10 }
 0x17c   : > { %v429_v11 = vpop.xlane.xlu0 %428 }
 0x17d   : > { %v430_v12 = vsub.f32 %v424_v9, %v429_v11 }
 0x17f   : > { %v431_v13 = vmul.f32 1.442695, %v430_v12 }
 0x181   : > { %1292 = vpow2.f32 %v431_v13 }
 0x18b   : > { %v1293_v14 = vpop.eup %1292 }
 0x18c   : > { %v433_v15 = vsel %vm425_vm2, %v1293_v14, 0.0 }
 0x18d   : > { %434 = vadd.xlane.f32.xlu0 %v433_v15 }
 0x1a3   : > { %695 = vrot.lane.b32.xlu0 %v335_v1, %s1319_s18 }
 0x21a   : > { %v435_v18 = vpop.xlane.xlu0 %434 }
 0x21b   : > { %1294 = vrcp.f32 %v435_v18 }
 0x21e   : > { %v696_v23 = vpop.permute.xlu0 %695 }
 0x225   : > { %v1295_v20 = vpop.eup %1294 }
 0x226   : > { %v437_v22 = vmul.f32 %v1295_v20, %v1293_v14 }
 0x228   : > { %1244 = vmatmul.mubr.msk.f32.vlgmr.msra.gmra.mrb[0].mxu1 %vm425_vm2, %v437_v22 }
 0x229   : > { %1247 = vmatpush3.xpose.msk.msra.mxu1 %vm345_vm1, %v519_v17  ;;  %1248 = vmatprep.mubr.msk.f32.mxu1 %vm1317_vm0, %v1316_v0 }
 0x22a   : > { %1256 = vmatprep.subr.mxu1 %v1316_v0 }
 0x22c   : > { %1249 = vmatmul.mubr.msk.f32.vlgmr.msra.gmra.mrb[2].mxu1 %vm345_vm1, %v517_v19 }
 0x22d   : > { %1257 = vmatpush3.xpose.msk.msra.mxu1 %vm345_vm1, %v696_v23  ;;  %1258 = vmatprep.mubr.msk.f32.mxu1 %vm1317_vm0, %v1316_v0 }
 0x22e   : > { %1266 = vmatprep.subr.mxu1 %v1316_v0 }
 0x230   : > { %1259 = vmatmul.mubr.msk.f32.vlgmr.msra.gmra.mrb[4].mxu1 %vm345_vm1, %v694_v21 }
 0x231   : > { %1267 = vmatpush3.xpose.msk.msra.mxu1 %vm345_vm1, %v873_v24  ;;  %1268 = vmatprep.mubr.msk.f32.mxu1 %vm1317_vm0, %v1316_v0 }
 0x234   : > { %1269 = vmatmul.mubr.msk.f32.vlgmr.msra.gmra.mrb[6].mxu1 %vm345_vm1, %v871_v25 }
 0x2fb   : > { %v511_v26 = vpop.f32.mrb[0].mxu1 }
 0x2fc   : > { %515 = vst.msk [vmem:[%s1450_s28] sm:$0xff] %vm345_vm1, %v511_v26  ;;  %v1245_v27 = vpop.f32.mrb[1].mxu1 }
 0x2ff   : > { %v590_v29 = vpop.f32.mrb[2].mxu1 }
 0x300   : > { %v594_v30 = vmul.f32 0.35355338, %v590_v29  ;;  %v1250_v31 = vpop.f32.mrb[3].mxu1 }
 0x302   : > { %v595_v33 = vmul.f32 %v594_v30, %v338_v28 }
 0x303   : > { %v767_v35 = vpop.f32.mrb[4].mxu1 }
 0x304   : > { %v596_v36 = vadd.f32 %v595_v33, %v342_v32  ;;  %v771_v37 = vmul.f32 0.35355338, %v767_v35  ;;  %v1260_v38 = vpop.f32.mrb[5].mxu1 }
 0x306   : > { %1202 = vst.msk [vmem:[%s1408_s16 + $0x8] sm:$0xff] %vm425_vm2, %v596_v36  ;;  %v772_v40 = vmul.f32 %v771_v37, %v339_v34  ;;  %v599_v41 = vsel %vm425_vm2, %v596_v36, -inf }
 0x307   : > { %600 = vmax.xlane.f32.xlu1 %v599_v41  ;;  %v944_v43 = vpop.f32.mrb[6].mxu1 }
 0x308   : > { %v773_v44 = vadd.f32 %v772_v40, %v343_v39  ;;  %v948_v45 = vmul.f32 0.35355338, %v944_v43  ;;  %v1270_v46 = vpop.f32.mrb[7].mxu1 }
 0x30a   : > { %1207 = vst.msk [vmem:[%s1408_s16 + $0x10] sm:$0xff] %vm425_vm2, %v773_v44  ;;  %v949_v48 = vmul.f32 %v948_v45, %v340_v42  ;;  %v776_v49 = vsel %vm425_vm2, %v773_v44, -inf }
 0x30b   : > { %777 = vmax.xlane.f32.xlu0 %v776_v49 }
 0x30c   : > { %v950_v50 = vadd.f32 %v949_v48, %v344_v47 }
 0x30e   : > { %1212 = vst.msk [vmem:[%s1408_s16 + $0x18] sm:$0xff] %vm425_vm2, %v950_v50  ;;  %v953_v51 = vsel %vm425_vm2, %v950_v50, -inf }
 0x30f   : > { %954 = vmax.xlane.f32.xlu1 %v953_v51 }
 0x394   : > { %v601_v52 = vpop.xlane.xlu1 %600 }
 0x395   : > { %v602_v53 = vsub.f32 %v596_v36, %v601_v52 }
 0x397   : > { %v603_v54 = vmul.f32 1.442695, %v602_v53 }
 0x398   : > { %v778_v55 = vpop.xlane.xlu0 %777 }
 0x399   : > { %1296 = vpow2.f32 %v603_v54  ;;  %v779_v56 = vsub.f32 %v773_v44, %v778_v55 }
 0x39b   : > { %v780_v57 = vmul.f32 1.442695, %v779_v56 }
 0x39c   : > { %v955_v62 = vpop.xlane.xlu1 %954 }
 0x39d   : > { %1298 = vpow2.f32 %v780_v57  ;;  %v956_v63 = vsub.f32 %v950_v50, %v955_v62 }
 0x39f   : > { %v957_v1 = vmul.f32 1.442695, %v956_v63 }
 0x3a1   : > { %1300 = vpow2.f32 %v957_v1 }
 0x3a3   : > { %v1297_v58 = vpop.eup %1296 }
 0x3a4   : > { %v605_v59 = vsel %vm425_vm2, %v1297_v58, 0.0 }
 0x3a5   : > { %606 = vadd.xlane.f32.xlu1 %v605_v59 }
 0x3a7   : > { %v1299_v60 = vpop.eup %1298 }
 0x3a8   : > { %v782_v61 = vsel %vm425_vm2, %v1299_v60, 0.0 }
 0x3a9   : > { %783 = vadd.xlane.f32.xlu0 %v782_v61 }
 0x3ab   : > { %v1301_v2 = vpop.eup %1300 }
 0x3ac   : > { %v959_v3 = vsel %vm425_vm2, %v1301_v2, 0.0 }
 0x3b6   : > { %787 = vrot.lane.b32.xlu1 %v1424_v16, %s1319_s18 }
 0x3bf   : > { %610 = vrot.lane.b32.xlu0 %v1424_v16, %s1318_s17 }
 0x3da   : > { %960 = vadd.xlane.f32.xlu1 %v959_v3 }
 0x3eb   : > { %964 = vrot.lane.b32.xlu1 %v1424_v16, %s1320_s19 }
 0x432   : > { %v607_v4 = vpop.xlane.xlu1 %606 }
 0x433   : > { %1302 = vrcp.f32 %v607_v4 }
 0x436   : > { %v784_v5 = vpop.xlane.xlu0 %783  ;;  %v788_v9 = vpop.permute.xlu1 %787 }
 0x437   : > { %1304 = vrcp.f32 %v784_v5 }
 0x43a   : > { %v611_v6 = vpop.permute.xlu0 %610 }
 0x43b   : > { %1252 = vmatpush3.msk.msra.mxu0 %vm441_vm3, %v611_v6 }
 0x43c   : > { %1261 = vmatprep.subr.mxu0 %v1316_v0 }
 0x43d   : > { %v1303_v7 = vpop.eup %1302 }
 0x43e   : > { %v609_v8 = vmul.f32 %v1303_v7, %v1297_v58 }
 0x440   : > { %1254 = vmatmul.mubr.msk.f32.vlgmr.msra.gmra.mrb[2].mxu0 %vm425_vm2, %v609_v8 }
 0x441   : > { %v1305_v10 = vpop.eup %1304  ;;  %1262 = vmatpush3.msk.msra.mxu0 %vm441_vm3, %v788_v9  ;;  %1263 = vmatprep.mubr.msk.f32.mxu0 %vm1317_vm0, %v1316_v0 }
 0x442   : > { %v786_v11 = vmul.f32 %v1305_v10, %v1299_v60  ;;  %1271 = vmatprep.subr.mxu0 %v1316_v0 }
 0x444   : > { %1264 = vmatmul.mubr.msk.f32.vlgmr.msra.gmra.mrb[4].mxu0 %vm425_vm2, %v786_v11 }
 0x445   : > { %1273 = vmatprep.mubr.msk.f32.mxu0 %vm1317_vm0, %v1316_v0 }
 0x467   : > { %v961_v12 = vpop.xlane.xlu1 %960 }
 0x468   : > { %1306 = vrcp.f32 %v961_v12 }
 0x46b   : > { %v965_v13 = vpop.permute.xlu1 %964 }
 0x46c   : > { %1272 = vmatpush3.msk.msra.mxu0 %vm441_vm3, %v965_v13 }
 0x472   : > { %v1307_v14 = vpop.eup %1306 }
 0x473   : > { %v963_v15 = vmul.f32 %v1307_v14, %v1301_v2 }
 0x475   : > { %1274 = vmatmul.mubr.msk.f32.vlgmr.msra.gmra.mrb[6].mxu0 %vm425_vm2, %v963_v15 }
 0x513   : > { %v683_v16 = vpop.f32.mrb[2].mxu0 }
 0x514   : > { %688 = vrot.lane.b32.xlu0 %v683_v16, %s1321_s22  ;;  %v1255_v17 = vpop.f32.mrb[3].mxu0 }
 0x517   : > { %v860_v18 = vpop.f32.mrb[4].mxu0 }
 0x518   : > { %865 = vrot.lane.b32.xlu1 %v860_v18, %s1322_s24  ;;  %v1265_v0 = vpop.f32.mrb[5].mxu0 }
 0x548   : > { %v1037_v19 = vpop.f32.mrb[6].mxu0 }
 0x549   : > { %1042 = vrot.lane.b32.xlu0 %v1037_v19, %s1323_s29  ;;  %v1275_v20 = vpop.f32.mrb[7].mxu0 }
 0x586   : > { %v689_v21 = vpop.permute.xlu0 %688 }
 0x587   : > { %692 = vst.msk [vmem:[%s1450_s28] sm:$0xff] %vm691_vm4, %v689_v21 }
 0x58a   : > { %v866_v22 = vpop.permute.xlu1 %865 }
 0x58b   : > { %869 = vst.msk [vmem:[%s1450_s28] sm:$0xff] %vm868_vm5, %v866_v22 }
 0x5bb   : > { %v1043_v23 = vpop.permute.xlu0 %1042 }
 0x5bc   : > { %1046 = vst.msk [vmem:[%s1450_s28] sm:$0xff] %vm1045_vm6, %v1043_v23 }
 0x5bd PF: > { %s17_s21 = sadd.s32 1, %s1314_s21  }
 0x5be   : > { %p14_p4 = scmp.ge.s32.totalorder %s17_s21, 4  }
 0x5c0   :  { %16 = sbr.rel (!%p14_p4) target bundleno = 1 (0x1), region = 97 }

// kernel: _lambda_.27
= control target key start
LH: loop header
LB: loop body
LE: loop exit
PB: predicated region body
PF: predicated region fallthrough
CT: control target
= control target key end

     0   :  { %s498_s12 = smov 0   ;;  %s500_s13 = smov 0   ;;  %s540_s0 = inlined_call_operand.vmem [shape: f32[16,32], index: 0, kind: input, shape index: {}]   ;;  %s541_s1 = inlined_call_operand.vmem [shape: bf16[32,128], index: 1, kind: input, shape index: {}]   ;;  %s542_s2 = inlined_call_operand.vmem [shape: f32[1,128], index: 2, kind: input, shape index: {}]   ;;  %s543_s3 = inlined_call_operand.vmem [shape: f32[16,128], index: 3, kind: output, shape index: {}]  }
   0x1   :  { %s502_s14 = smov 0  }
   0x2 LB: > { %s25_s15 = sadd.s32 1, %s470_s13  ;;  %p402_p0 = scmp.ge.s32.totalorder %s474_s14, 1  ;;  %s474_s14 = sphi %s502_s14, %s13_s14   ;;  %s470_s13 = sphi %s500_s13, %s545_s13   ;;  %s466_s12 = sphi %s498_s12, %s544_s12  }
   0x3   : > { %p27_p1 = scmp.ge.s32.totalorder %s25_s15, 2  ;;  %p167_p2 = scmp.lt.s32.totalorder %s474_s14, 3 }
   0x5   : > { %s547_s15 = smov (%p27_p1, %s25_s15), 0  ;;  %p168_p3 = pnand %p402_p0, %p167_p2 }
   0x6   : > { %v448_v0 = vld [vmem:[%s541_s1] sm:$0xff] (!%p168_p3)   ;;  %v476_v1 = vmov (!%p168_p3), 0.0   ;;  %v449_v2 = vld [vmem:[%s541_s1 + $0x8] sm:$0xff] (!%p168_p3)   ;;  %vm477_vm0 = vmmov (!%p168_p3), 0   ;;  %p199_p4 = scmp.lt.s32.totalorder (!%p168_p3), %s466_s12, 1  ;;  %vm243_vm1 = vcmask (!%p168_p3), 261120  }
   0x7   : > { %171 = sbr.rel (%p168_p3) target bundleno = 260 (0x104), region = 32  ;;  %414 = vmatprep.subr.bf16.mxu0 (!%p168_p3), %v476_v1  ;;  %418 = vmatprep.mubr.msk.bf16.mxu0 (!%p168_p3), %vm477_vm0, %v476_v1  ;;  %v405_v5 = vld [vmem:[%s542_s2] ss:$0 sm:$0xff] (!%p168_p3) }
   0x8   : > { %415 = vmatpush3.bf16.msra.mxu0 (!%p168_p3), %v448_v0 }
   0x9   : > { %416 = vmatprep.subr.bf16.mxu0 (!%p168_p3), %v476_v1 }
   0xc   : > { %417 = vmatpush3.bf16.msra.mxu0 (!%p168_p3), %v449_v2 }
   0xe   : > { %s549_s12 = smov (!%p199_p4, %s466_s12), 1 }
   0xf   : > { %s403_s20 = sshll.u32 %s549_s12, 3 }
  0x10   : > { %s202_s23 = scalar_lea.vmem %s540_s0, %s403_s20  ;;  %s216_s28 = scalar_lea.vmem %s543_s3, %s403_s20 }
  0x11   : > { %v218_v3 = vld [vmem:[%s202_s23] sm:$0xff] }
  0x12   : > { %v219_v4 = vpack.c.bf16 %v218_v3, %v218_v3 }
  0x14   : > { %419 = vmatmul.mubr.msk.bf16.vlgmr.msra.gmra.mrb[0].mxu0 %vm243_vm1, %v219_v4 }
  0xe7   : > { %v281_v6 = vpop.f32.mrb[0].mxu0 }
  0xe8   : > { %v282_v7 = vadd.f32 %v405_v5, %v281_v6  ;;  %v420_v8 = vpop.f32.mrb[1].mxu0 }
  0xe9   : > { %v284_v9 = vpop.f32.mrb[2].mxu0 }
  0xea   : > { %v288_v10 = vmul.f32 0.044715, %v282_v7  ;;  %v421_v11 = vpop.f32.mrb[3].mxu0  ;;  %v287_v17 = vmul.f32 0.5, %v282_v7 }
  0xec   : > { %v289_v12 = vmul.f32 %v288_v10, %v282_v7 }
  0xee   : > { %v290_v13 = vmul.f32 %v289_v12, %v282_v7 }
  0xf0   : > { %v291_v14 = vadd.f32 %v290_v13, %v282_v7 }
  0xf2   : > { %v292_v15 = vmul.f32 0.7978846, %v291_v14 }
  0xf4   : > { %450 = vtanh.f32 %v292_v15 }
  0xfe   : > { %v451_v16 = vpop.eup %450 }
  0xff   : > { %v294_v18 = vadd.f32 1.0, %v451_v16 }
 0x101   : > { %v295_v19 = vmul.f32 %v294_v18, %v287_v17 }
 0x103   : > { %296 = vst [vmem:[%s216_s28] sm:$0xff] %v295_v19 }
 0x104 PF: > { %s13_s14 = sadd.s32 1, %s474_s14   ;;  %s544_s12 = smov %s470_s13 }
 0x105   : > { %p10_p5 = scmp.ge.s32.totalorder %s13_s14, 4   ;;  %s545_s13 = smov %s547_s15 }
 0x107   :  { %12 = sbr.rel (!%p10_p5) target bundleno = 2 (0x2), region = 68 }

// kernel: _lambda_.28
= control target key start
LH: loop header
LB: loop body
LE: loop exit
PB: predicated region body
PF: predicated region fallthrough
CT: control target
= control target key end

     0   :  { %s561_s12 = smov 0   ;;  %s563_s13 = smov 0   ;;  %s621_s0 = inlined_call_operand.vmem [shape: f32[16,128], index: 0, kind: input, shape index: {}]   ;;  %s622_s1 = inlined_call_operand.vmem [shape: bf16[128,32], index: 1, kind: input, shape index: {}]   ;;  %s623_s2 = inlined_call_operand.vmem [shape: f32[1,32], index: 2, kind: input, shape index: {}]   ;;  %s624_s3 = inlined_call_operand.vmem [shape: f32[16,32], index: 3, kind: output, shape index: {}]  }
   0x1   :  { %s565_s14 = smov 0  }
   0x2 LB: > { %s25_s15 = sadd.s32 1, %s533_s13  ;;  %p438_p0 = scmp.ge.s32.totalorder %s537_s14, 1  ;;  %s537_s14 = sphi %s565_s14, %s13_s14   ;;  %s533_s13 = sphi %s563_s13, %s626_s13   ;;  %s529_s12 = sphi %s561_s12, %s625_s12  }
   0x3   : > { %p27_p1 = scmp.ge.s32.totalorder %s25_s15, 2  ;;  %p167_p2 = scmp.lt.s32.totalorder %s537_s14, 3 }
   0x5   : > { %s628_s15 = smov (%p27_p1, %s25_s15), 0  ;;  %p168_p3 = pnand %p438_p0, %p167_p2 }
   0x6   : > { %v507_v0 = vld [vmem:[%s622_s1] sm:$0xff] (!%p168_p3)   ;;  %v539_v1 = vmov (!%p168_p3), 0.0   ;;  %v508_v2 = vld [vmem:[%s622_s1 + $0x8] sm:$0xff] (!%p168_p3)   ;;  %vm540_vm0 = vmmov (!%p168_p3), 0   ;;  %v509_v3 = vld [vmem:[%s622_s1 + $0x10] sm:$0xff] (!%p168_p3)   ;;  %p199_p4 = scmp.lt.s32.totalorder (!%p168_p3), %s529_s12, 1 }
   0x7   : > { %171 = sbr.rel (%p168_p3) target bundleno = 254 (0xfe), region = 32  ;;  %461 = vmatprep.subr.bf16.mxu0 (!%p168_p3), %v539_v1  ;;  %477 = vmatprep.mubr.msk.bf16.mxu0 (!%p168_p3), %vm540_vm0, %v539_v1  ;;  %v510_v4 = vld [vmem:[%s622_s1 + $0x18] sm:$0xff] (!%p168_p3)   ;;  %v511_v5 = vld [vmem:[%s622_s1 + $0x20] sm:$0xff] (!%p168_p3)   ;;  %v512_v6 = vld [vmem:[%s622_s1 + $0x28] sm:$0xff] (!%p168_p3)   ;;  %vm331_vm1 = vcmask (!%p168_p3), 261120  }
   0x8   : > { %462 = vmatpush3.bf16.msra.mxu0 (!%p168_p3), %v507_v0  ;;  %v513_v7 = vld [vmem:[%s622_s1 + $0x30] sm:$0xff] (!%p168_p3)   ;;  %v514_v8 = vld [vmem:[%s622_s1 + $0x38] sm:$0xff] (!%p168_p3)   ;;  %v441_v11 = vld [vmem:[%s623_s2] ss:$0 sm:$0xff] (!%p168_p3) }
   0x9   : > { %463 = vmatprep.subr.bf16.mxu0 (!%p168_p3), %v539_v1 }
   0xc   : > { %464 = vmatpush3.bf16.msra.mxu0 (!%p168_p3), %v508_v2 }
   0xd   : > { %465 = vmatprep.subr.bf16.mxu0 (!%p168_p3), %v539_v1 }
   0xe   : > { %s630_s12 = smov (!%p199_p4, %s529_s12), 1 }
   0xf   : > { %s439_s28 = sshll.u32 %s630_s12, 3 }
  0x10   : > { %466 = vmatpush3.bf16.msra.mxu0 %v509_v3  ;;  %s202_s6 = scalar_lea.vmem %s621_s0, %s439_s28  ;;  %s216_s16 = scalar_lea.vmem %s624_s3, %s439_s28 }
  0x11   : > { %467 = vmatprep.subr.bf16.mxu0 %v539_v1  ;;  %v218_v9 = vld [vmem:[%s202_s6] sm:$0xff] }
  0x12   : > { %v219_v10 = vpack.c.bf16 %v218_v9, %v218_v9 }
  0x14   : > { %468 = vmatpush3.bf16.msra.mxu0 %v510_v4 }
  0x15   : > { %469 = vmatprep.subr.bf16.mxu0 %v539_v1 }
  0x18   : > { %470 = vmatpush3.bf16.msra.mxu0 %v511_v5 }
  0x19   : > { %471 = vmatprep.subr.bf16.mxu0 %v539_v1 }
  0x1c   : > { %472 = vmatpush3.bf16.msra.mxu0 %v512_v6 }
  0x1d   : > { %473 = vmatprep.subr.bf16.mxu0 %v539_v1 }
  0x20   : > { %474 = vmatpush3.bf16.msra.mxu0 %v513_v7 }
  0x21   : > { %475 = vmatprep.subr.bf16.mxu0 %v539_v1 }
  0x24   : > { %476 = vmatpush3.bf16.msra.mxu0 %v514_v8 }
  0x27   : > { %478 = vmatmul.mubr.bf16.vlgmr.msra.gmra.mrb[0].mxu0 %v219_v10 }
  0xfa   : > { %v325_v12 = vpop.f32.mrb[0].mxu0 }
  0xfb   : > { %v326_v13 = vadd.f32 %v441_v11, %v325_v12  ;;  %v479_v14 = vpop.f32.mrb[1].mxu0 }
  0xfc   : > { %v328_v15 = vpop.f32.mrb[2].mxu0 }
  0xfd   : > { %332 = vst.msk [vmem:[%s216_s16] sm:$0xff] %vm331_vm1, %v326_v13  ;;  %v480_v16 = vpop.f32.mrb[3].mxu0 }
  0xfe PF: > { %s13_s14 = sadd.s32 1, %s537_s14   ;;  %s625_s12 = smov %s533_s13 }
  0xff   : > { %p10_p5 = scmp.ge.s32.totalorder %s13_s14, 4   ;;  %s626_s13 = smov %s628_s15 }
 0x101   :  { %12 = sbr.rel (!%p10_p5) target bundleno = 2 (0x2), region = 68 }

</bundles_post_ra>
